<compile_context>
chip_gen: v7x
topology: tpu7x:2x2x1
jax: 0.10.0
libtpu: 0.0.40
codegen_flags: <defaults>
</compile_context>

<pallas_src>
import math

import jax
import jax.numpy as jnp
import numpy as np
from jax.experimental import pallas as pl
from jax.experimental.pallas import tpu as pltpu


def _gelu(x):
    # exact (erf-based) GELU, matching torch.nn.GELU() default
    return 0.5 * x * (1.0 + jax.lax.erf(x * (1.0 / math.sqrt(2.0))))


# Left halo padding of the scratch W axis is kept at 8 so the interior store
# lands on a sublane-aligned offset (only 1 column of it is actually used).
_LPAD = 8


def dwconv_gate_kernel(x_ref, dww_ref, dwb_ref, w1t_ref, b1_ref,
                       w2t_ref, b2_ref, wgt_ref, bg_ref, out_ref, xpad_scr):
    # x_ref    : (Nb, H, W, C)     input block (unpadded)
    # dww_ref  : (K, K, 2C)        fused depthwise weights (both branches)
    # dwb_ref  : (1, 2C)
    # w1t_ref  : (2CE, 2C)         block-diagonal, transposed
    # b1_ref   : (2CE, 1)
    # w2t_ref  : (C, 2CE)          block-diagonal, transposed
    # b2_ref   : (C, 1)
    # wgt_ref  : (C, C)            gate weight, transposed
    # bg_ref   : (C, 1)
    # out_ref  : (Nb, 1, H*W)      lane-dense output block
    # xpad_scr : (Nb, H+2p, _LPAD+W+p, 2C) VMEM scratch for zero padding
    Nb, H, W, C = x_ref.shape
    C2 = 2 * C
    K = dww_ref.shape[0]
    p = K // 2
    HW = H * W
    M = Nb * HW

    # ---- in-kernel zero padding (no HBM round trip through jnp.pad).
    # Re-zero every step: with megacore ("parallel") grid splitting we cannot
    # rely on a program_id==0 init running on every core.  Cost is ~70 vregs.
    xpad_scr[...] = jnp.zeros_like(xpad_scr)
    x2 = jnp.concatenate([x_ref[...], x_ref[...]], axis=-1)        # (Nb,H,W,2C)
    xpad_scr[:, p:p + H, _LPAD:_LPAD + W, :] = x2

    # ---- fused two-branch depthwise KxK conv: each shifted slab loaded once
    # and multiplied by the 2C-wide tap (both branches at once).
    acc = jnp.zeros((Nb, H, W, C2), jnp.float32)
    for dy in range(K):
        for dx in range(K):
            tap = dww_ref[dy, dx:dx + 1, :]                        # (1, 2C)
            off = _LPAD - p + dx
            slab = xpad_scr[:, dy:dy + H, off:off + W, :]          # (Nb,H,W,2C)
            acc = acc + slab * tap

    y = _gelu(acc.reshape(M, C2) + dwb_ref[...])                   # (M, 2C)

    # ---- 1x1 convs as block-diagonal matmuls.  The first dot contracts the
    # last dims of both operands (flash-attention "NT" pattern), producing a
    # channels-first (2CE, M) result; from here on every elementwise pass runs
    # on lane-dense (chan, Nb*H*W) tiles and the final channel-sum is already
    # laid out for a lane-dense (Nb, H*W) store.
    nt = (((1,), (1,)), ((), ()))
    z1 = _gelu(jax.lax.dot_general(w1t_ref[...], y, nt,
                                   preferred_element_type=jnp.float32)
               + b1_ref[...])                                      # (2CE, M)
    z2 = _gelu(jnp.dot(w2t_ref[...], z1,
                       preferred_element_type=jnp.float32)
               + b2_ref[...])                                      # (C, M) = concat^T
    g = jax.nn.sigmoid(jnp.dot(wgt_ref[...], z2,
                               preferred_element_type=jnp.float32)
                       + bg_ref[...])                              # (C, M)
    out = jnp.sum(z2 * g, axis=0, keepdims=True)                   # (1, M)

    for i in range(Nb):                                            # static unroll
        out_ref[i, :, :] = out[:, i * HW:(i + 1) * HW]


def _fuse_params(params):
    """Fold the two branches into block-diagonal / stacked fused weights."""
    dw_w, dw_b = params["dw_w"], params["dw_b"]   # (2,K,K,C), (2,C)
    w1, b1 = params["w1"], params["b1"]           # (2,C,CE), (2,CE)
    w2, b2 = params["w2"], params["b2"]           # (2,CE,Ch), (2,Ch)
    wg, bg = params["wg"], params["bg"]           # (C,C), (1,C)
    C = dw_w.shape[-1]
    CE = w1.shape[-1]
    Ch = w2.shape[-1]

    dww_f = jnp.concatenate([dw_w[0], dw_w[1]], axis=-1)            # (K,K,2C)
    dwb_row = jnp.concatenate([dw_b[0], dw_b[1]])[None, :]          # (1,2C)

    w1t = jnp.zeros((2 * CE, 2 * C), jnp.float32)
    w1t = w1t.at[:CE, :C].set(w1[0].T).at[CE:, C:].set(w1[1].T)     # (2CE,2C)
    b1c = jnp.concatenate([b1[0], b1[1]])[:, None]                  # (2CE,1)

    w2t = jnp.zeros((2 * Ch, 2 * CE), jnp.float32)
    w2t = w2t.at[:Ch, :CE].set(w2[0].T).at[Ch:, CE:].set(w2[1].T)   # (C,2CE)
    b2c = jnp.concatenate([b2[0], b2[1]])[:, None]                  # (C,1)

    wgt = wg.T                                                      # (C,C)
    bgc = bg[0][:, None]                                            # (C,1)
    return dww_f, dwb_row, w1t, b1c, w2t, b2c, wgt, bgc


def _pick_batch_block(N, nb_max=8):
    """Largest divisor of N <= nb_max that keeps >= 2 grid steps (v7x megacore)."""
    best = 1
    for nb in range(1, min(N, nb_max) + 1):
        if N % nb == 0 and (N == 1 or N // nb >= 2):
            best = nb
    return best


def dwconv_with_gate(x_nhwc, params):
    # TODO(synk): assumes both branches share the same kernel size (default [3,3]);
    # unequal kernel sizes would need per-branch depthwise passes.
    N, H, W, C = x_nhwc.shape
    K = params["dw_w"].shape[1]
    p = K // 2
    HW = H * W
    fused = _fuse_params(params)
    Nb = _pick_batch_block(N)

    def rep_spec(arr):
        nd = arr.ndim
        return pl.BlockSpec(arr.shape, lambda n, _nd=nd: (0,) * _nd)

    grid_spec = pltpu.PrefetchScalarGridSpec(
        num_scalar_prefetch=0,
        grid=(N // Nb,),
        in_specs=[pl.BlockSpec((Nb, H, W, C), lambda n: (n, 0, 0, 0))]
                 + [rep_spec(w) for w in fused],
        out_specs=pl.BlockSpec((Nb, 1, HW), lambda n: (n, 0, 0)),
        scratch_shapes=[pltpu.VMEM((Nb, H + 2 * p, _LPAD + W + p, 2 * C),
                                   jnp.float32)],
    )

    out = pl.pallas_call(
        dwconv_gate_kernel,
        out_shape=jax.ShapeDtypeStruct((N, 1, HW), jnp.float32),
        grid_spec=grid_spec,
        compiler_params=pltpu.CompilerParams(
            dimension_semantics=("parallel",)),
    )(x_nhwc, *fused)

    return out.reshape(N, H, W, 1)


def init_params(key, C, E, K=3, eps=1e-5):
    """Deterministic synthetic parameters; BN (eval mode) folded into convs."""
    Ch = C // 2
    CE = C * E
    keys = iter(jax.random.split(key, 64))
    nk = lambda: next(keys)

    def bn_fold(n):
        gamma = 1.0 + 0.1 * jax.random.normal(nk(), (n,), jnp.float32)
        beta = 0.1 * jax.random.normal(nk(), (n,), jnp.float32)
        mean = 0.1 * jax.random.normal(nk(), (n,), jnp.float32)
        var = 1.0 + 0.1 * jax.random.uniform(nk(), (n,), jnp.float32)
        s = gamma / jnp.sqrt(var + eps)
        return s, beta - s * mean

    dw_w, dw_b, w1, b1, w2, b2 = [], [], [], [], [], []
    for _ in range(2):  # two branches, both kernel_size = 3
        w = 0.3 * jax.random.normal(nk(), (K, K, C), jnp.float32)
        b = 0.1 * jax.random.normal(nk(), (C,), jnp.float32)
        s, t = bn_fold(C)
        dw_w.append(w * s)
        dw_b.append(s * b + t)
        w = 0.3 * jax.random.normal(nk(), (C, CE), jnp.float32)
        b = 0.1 * jax.random.normal(nk(), (CE,), jnp.float32)
        s, t = bn_fold(CE)
        w1.append(w * s[None, :])
        b1.append(s * b + t)
        w = 0.3 * jax.random.normal(nk(), (CE, Ch), jnp.float32)
        b = 0.1 * jax.random.normal(nk(), (Ch,), jnp.float32)
        s, t = bn_fold(Ch)
        w2.append(w * s[None, :])
        b2.append(s * b + t)

    w = 0.3 * jax.random.normal(nk(), (C, C), jnp.float32)
    b = 0.1 * jax.random.normal(nk(), (C,), jnp.float32)
    s, t = bn_fold(C)
    wg = w * s[None, :]
    bg = (s * b + t)[None, :]

    return dict(
        dw_w=jnp.stack(dw_w), dw_b=jnp.stack(dw_b),
        w1=jnp.stack(w1), b1=jnp.stack(b1),
        w2=jnp.stack(w2), b2=jnp.stack(b2),
        wg=wg, bg=bg,
    )


def reference(x_nhwc, params):
    """Plain-JAX reference with identical (BN-folded) math, for validation."""
    N, H, W, C = x_nhwc.shape
    K = params["dw_w"].shape[1]
    p = K // 2
    xpad = jnp.pad(x_nhwc, ((0, 0), (p, p), (p, p), (0, 0)))
    outs = []
    for b in range(2):
        acc = jnp.zeros((N, H, W, C), jnp.float32)
        for dy in range(K):
            for dx in range(K):
                acc = acc + xpad[:, dy:dy + H, dx:dx + W, :] * params["dw_w"][b, dy, dx]
        acc = acc + params["dw_b"][b]
        y = _gelu(acc)
        z1 = _gelu(jnp.einsum("nhwc,cd->nhwd", y, params["w1"][b]) + params["b1"][b])
        z2 = _gelu(jnp.einsum("nhwc,cd->nhwd", z1, params["w2"][b]) + params["b2"][b])
        outs.append(z2)
    concat = jnp.concatenate(outs, axis=-1)
    g = jax.nn.sigmoid(
        jnp.einsum("nhwc,cd->nhwd", concat, params["wg"]) + params["bg"][0])
    return jnp.sum(concat * g, axis=-1, keepdims=True)


if __name__ == "__main__":
    # TODO(synk): BatchNorm is implemented in eval mode (running stats folded
    # into convs); training-mode batch-statistic computation is not in-kernel.
    N, C, H, W, E = 2, 4, 16, 16, 4
    key = jax.random.PRNGKey(0)
    kx, kp = jax.random.split(key)
    x = jax.random.normal(kx, (N, H, W, C), jnp.float32)   # NHWC (== NCHW [2,4,16,16])
    params = init_params(kp, C, E)

    out = dwconv_with_gate(x, params)
    out = jax.block_until_ready(out)

    ref = reference(x, params)
    assert out.shape == (N, H, W, 1)
    np.testing.assert_allclose(np.asarray(out), np.asarray(ref),
                               rtol=1e-4, atol=1e-4)
    print("KERNEL_OK")
</pallas_src>

<mosaic_0001>
module attributes {stable_mosaic.version = 11 : i64} {
  func.func @dwconv_gate_kernel(%arg0: i32, %arg1: memref<1x16x16x4xf32, #tpu.memory_space<vmem>>, %arg2: memref<3x3x8xf32, #tpu.memory_space<vmem>>, %arg3: memref<1x8xf32, #tpu.memory_space<vmem>>, %arg4: memref<32x8xf32, #tpu.memory_space<vmem>>, %arg5: memref<32x1xf32, #tpu.memory_space<vmem>>, %arg6: memref<4x32xf32, #tpu.memory_space<vmem>>, %arg7: memref<4x1xf32, #tpu.memory_space<vmem>>, %arg8: memref<4x4xf32, #tpu.memory_space<vmem>>, %arg9: memref<4x1xf32, #tpu.memory_space<vmem>>, %arg10: memref<1x1x256xf32, #tpu.memory_space<vmem>>, %arg11: memref<1x18x25x8xf32, #tpu.memory_space<vmem>>) attributes {dimension_semantics = [#tpu.dimension_semantics<parallel>], iteration_bounds = array<i64: 2>, scalar_prefetch = 0 : i64, scratch_operands = 1 : i64, tpu.core_type = #tpu.core_type<tc>, window_params = [{transform_indices = @transform_0, window_bounds = array<i64: 1, 16, 16, 4>}, {pipeline_mode = #tpu.pipeline_mode<synchronous>, transform_indices = @transform_1, window_bounds = array<i64: 3, 3, 8>}, {pipeline_mode = #tpu.pipeline_mode<synchronous>, transform_indices = @transform_2, window_bounds = array<i64: 1, 8>}, {pipeline_mode = #tpu.pipeline_mode<synchronous>, transform_indices = @transform_3, window_bounds = array<i64: 32, 8>}, {pipeline_mode = #tpu.pipeline_mode<synchronous>, transform_indices = @transform_4, window_bounds = array<i64: 32, 1>}, {pipeline_mode = #tpu.pipeline_mode<synchronous>, transform_indices = @transform_5, window_bounds = array<i64: 4, 32>}, {pipeline_mode = #tpu.pipeline_mode<synchronous>, transform_indices = @transform_6, window_bounds = array<i64: 4, 1>}, {pipeline_mode = #tpu.pipeline_mode<synchronous>, transform_indices = @transform_7, window_bounds = array<i64: 4, 4>}, {pipeline_mode = #tpu.pipeline_mode<synchronous>, transform_indices = @transform_8, window_bounds = array<i64: 4, 1>}, {transform_indices = @transform_9, window_bounds = array<i64: 1, 1, 256>}]} {
    %cst = arith.constant 0.000000e+00 : f32
    %0 = vector.broadcast %cst : f32 to vector<1x18x25x8xf32>
    %c0 = arith.constant 0 : index
    %c0_0 = arith.constant 0 : index
    %c0_1 = arith.constant 0 : index
    %c0_2 = arith.constant 0 : index
    %1 = vector.load %arg11[%c0, %c0_0, %c0_1, %c0_2] : memref<1x18x25x8xf32, #tpu.memory_space<vmem>>, vector<1x18x25x8xf32>
    tpu.vector_store %arg11[%c0, %c0_0, %c0_1, %c0_2], %0 {strides = array<i32>} : memref<1x18x25x8xf32, #tpu.memory_space<vmem>>, vector<1x18x25x8xf32>,
    %c0_3 = arith.constant 0 : index
    %c0_4 = arith.constant 0 : index
    %c0_5 = arith.constant 0 : index
    %c0_6 = arith.constant 0 : index
    %2 = vector.load %arg1[%c0_3, %c0_4, %c0_5, %c0_6] : memref<1x16x16x4xf32, #tpu.memory_space<vmem>>, vector<1x16x16x4xf32>
    %c0_7 = arith.constant 0 : index
    %c0_8 = arith.constant 0 : index
    %c0_9 = arith.constant 0 : index
    %c0_10 = arith.constant 0 : index
    %3 = vector.load %arg1[%c0_7, %c0_8, %c0_9, %c0_10] : memref<1x16x16x4xf32, #tpu.memory_space<vmem>>, vector<1x16x16x4xf32>
    %4 = tpu.concatenate %2, %3 in 3 : vector<1x16x16x4xf32>, vector<1x16x16x4xf32> -> vector<1x16x16x8xf32>
    %c0_11 = arith.constant 0 : index
    %c1 = arith.constant 1 : index
    %c8 = arith.constant 8 : index
    %c0_12 = arith.constant 0 : index
    %5 = vector.load %arg11[%c0_11, %c1, %c8, %c0_12] : memref<1x18x25x8xf32, #tpu.memory_space<vmem>>, vector<1x16x16x8xf32>
    tpu.vector_store %arg11[%c0_11, %c1, %c8, %c0_12], %4 {strides = array<i32>} : memref<1x18x25x8xf32, #tpu.memory_space<vmem>>, vector<1x16x16x8xf32>,
    %cst_13 = arith.constant 0.000000e+00 : f32
    %6 = vector.broadcast %cst_13 : f32 to vector<1x16x16x8xf32>
    %c0_14 = arith.constant 0 : index
    %c0_15 = arith.constant 0 : index
    %c0_16 = arith.constant 0 : index
    %7 = vector.load %arg2[%c0_14, %c0_15, %c0_16] : memref<3x3x8xf32, #tpu.memory_space<vmem>>, vector<1x1x8xf32>
    %8 = vector.shape_cast %7 : vector<1x1x8xf32> to vector<1x8xf32>
    %c0_17 = arith.constant 0 : index
    %c0_18 = arith.constant 0 : index
    %c7 = arith.constant 7 : index
    %c0_19 = arith.constant 0 : index
    %9 = vector.load %arg11[%c0_17, %c0_18, %c7, %c0_19] : memref<1x18x25x8xf32, #tpu.memory_space<vmem>>, vector<1x16x16x8xf32>
    %10 = vector.shape_cast %8 : vector<1x8xf32> to vector<1x1x1x8xf32>
    %11 = vector.broadcast %10 : vector<1x1x1x8xf32> to vector<1x16x16x8xf32>
    %12 = arith.mulf %9, %11 : vector<1x16x16x8xf32>
    %13 = arith.addf %6, %12 : vector<1x16x16x8xf32>
    %c0_20 = arith.constant 0 : index
    %c1_21 = arith.constant 1 : index
    %c0_22 = arith.constant 0 : index
    %14 = vector.load %arg2[%c0_20, %c1_21, %c0_22] : memref<3x3x8xf32, #tpu.memory_space<vmem>>, vector<1x1x8xf32>
    %15 = vector.shape_cast %14 : vector<1x1x8xf32> to vector<1x8xf32>
    %c0_23 = arith.constant 0 : index
    %c0_24 = arith.constant 0 : index
    %c8_25 = arith.constant 8 : index
    %c0_26 = arith.constant 0 : index
    %16 = vector.load %arg11[%c0_23, %c0_24, %c8_25, %c0_26] : memref<1x18x25x8xf32, #tpu.memory_space<vmem>>, vector<1x16x16x8xf32>
    %17 = vector.shape_cast %15 : vector<1x8xf32> to vector<1x1x1x8xf32>
    %18 = vector.broadcast %17 : vector<1x1x1x8xf32> to vector<1x16x16x8xf32>
    %19 = arith.mulf %16, %18 : vector<1x16x16x8xf32>
    %20 = arith.addf %13, %19 : vector<1x16x16x8xf32>
    %c0_27 = arith.constant 0 : index
    %c2 = arith.constant 2 : index
    %c0_28 = arith.constant 0 : index
    %21 = vector.load %arg2[%c0_27, %c2, %c0_28] : memref<3x3x8xf32, #tpu.memory_space<vmem>>, vector<1x1x8xf32>
    %22 = vector.shape_cast %21 : vector<1x1x8xf32> to vector<1x8xf32>
    %c0_29 = arith.constant 0 : index
    %c0_30 = arith.constant 0 : index
    %c9 = arith.constant 9 : index
    %c0_31 = arith.constant 0 : index
    %23 = vector.load %arg11[%c0_29, %c0_30, %c9, %c0_31] : memref<1x18x25x8xf32, #tpu.memory_space<vmem>>, vector<1x16x16x8xf32>
    %24 = vector.shape_cast %22 : vector<1x8xf32> to vector<1x1x1x8xf32>
    %25 = vector.broadcast %24 : vector<1x1x1x8xf32> to vector<1x16x16x8xf32>
    %26 = arith.mulf %23, %25 : vector<1x16x16x8xf32>
    %27 = arith.addf %20, %26 : vector<1x16x16x8xf32>
    %c1_32 = arith.constant 1 : index
    %c0_33 = arith.constant 0 : index
    %c0_34 = arith.constant 0 : index
    %28 = vector.load %arg2[%c1_32, %c0_33, %c0_34] : memref<3x3x8xf32, #tpu.memory_space<vmem>>, vector<1x1x8xf32>
    %29 = vector.shape_cast %28 : vector<1x1x8xf32> to vector<1x8xf32>
    %c0_35 = arith.constant 0 : index
    %c1_36 = arith.constant 1 : index
    %c7_37 = arith.constant 7 : index
    %c0_38 = arith.constant 0 : index
    %30 = vector.load %arg11[%c0_35, %c1_36, %c7_37, %c0_38] : memref<1x18x25x8xf32, #tpu.memory_space<vmem>>, vector<1x16x16x8xf32>
    %31 = vector.shape_cast %29 : vector<1x8xf32> to vector<1x1x1x8xf32>
    %32 = vector.broadcast %31 : vector<1x1x1x8xf32> to vector<1x16x16x8xf32>
    %33 = arith.mulf %30, %32 : vector<1x16x16x8xf32>
    %34 = arith.addf %27, %33 : vector<1x16x16x8xf32>
    %c1_39 = arith.constant 1 : index
    %c1_40 = arith.constant 1 : index
    %c0_41 = arith.constant 0 : index
    %35 = vector.load %arg2[%c1_39, %c1_40, %c0_41] : memref<3x3x8xf32, #tpu.memory_space<vmem>>, vector<1x1x8xf32>
    %36 = vector.shape_cast %35 : vector<1x1x8xf32> to vector<1x8xf32>
    %c0_42 = arith.constant 0 : index
    %c1_43 = arith.constant 1 : index
    %c8_44 = arith.constant 8 : index
    %c0_45 = arith.constant 0 : index
    %37 = vector.load %arg11[%c0_42, %c1_43, %c8_44, %c0_45] : memref<1x18x25x8xf32, #tpu.memory_space<vmem>>, vector<1x16x16x8xf32>
    %38 = vector.shape_cast %36 : vector<1x8xf32> to vector<1x1x1x8xf32>
    %39 = vector.broadcast %38 : vector<1x1x1x8xf32> to vector<1x16x16x8xf32>
    %40 = arith.mulf %37, %39 : vector<1x16x16x8xf32>
    %41 = arith.addf %34, %40 : vector<1x16x16x8xf32>
    %c1_46 = arith.constant 1 : index
    %c2_47 = arith.constant 2 : index
    %c0_48 = arith.constant 0 : index
    %42 = vector.load %arg2[%c1_46, %c2_47, %c0_48] : memref<3x3x8xf32, #tpu.memory_space<vmem>>, vector<1x1x8xf32>
    %43 = vector.shape_cast %42 : vector<1x1x8xf32> to vector<1x8xf32>
    %c0_49 = arith.constant 0 : index
    %c1_50 = arith.constant 1 : index
    %c9_51 = arith.constant 9 : index
    %c0_52 = arith.constant 0 : index
    %44 = vector.load %arg11[%c0_49, %c1_50, %c9_51, %c0_52] : memref<1x18x25x8xf32, #tpu.memory_space<vmem>>, vector<1x16x16x8xf32>
    %45 = vector.shape_cast %43 : vector<1x8xf32> to vector<1x1x1x8xf32>
    %46 = vector.broadcast %45 : vector<1x1x1x8xf32> to vector<1x16x16x8xf32>
    %47 = arith.mulf %44, %46 : vector<1x16x16x8xf32>
    %48 = arith.addf %41, %47 : vector<1x16x16x8xf32>
    %c2_53 = arith.constant 2 : index
    %c0_54 = arith.constant 0 : index
    %c0_55 = arith.constant 0 : index
    %49 = vector.load %arg2[%c2_53, %c0_54, %c0_55] : memref<3x3x8xf32, #tpu.memory_space<vmem>>, vector<1x1x8xf32>
    %50 = vector.shape_cast %49 : vector<1x1x8xf32> to vector<1x8xf32>
    %c0_56 = arith.constant 0 : index
    %c2_57 = arith.constant 2 : index
    %c7_58 = arith.constant 7 : index
    %c0_59 = arith.constant 0 : index
    %51 = vector.load %arg11[%c0_56, %c2_57, %c7_58, %c0_59] : memref<1x18x25x8xf32, #tpu.memory_space<vmem>>, vector<1x16x16x8xf32>
    %52 = vector.shape_cast %50 : vector<1x8xf32> to vector<1x1x1x8xf32>
    %53 = vector.broadcast %52 : vector<1x1x1x8xf32> to vector<1x16x16x8xf32>
    %54 = arith.mulf %51, %53 : vector<1x16x16x8xf32>
    %55 = arith.addf %48, %54 : vector<1x16x16x8xf32>
    %c2_60 = arith.constant 2 : index
    %c1_61 = arith.constant 1 : index
    %c0_62 = arith.constant 0 : index
    %56 = vector.load %arg2[%c2_60, %c1_61, %c0_62] : memref<3x3x8xf32, #tpu.memory_space<vmem>>, vector<1x1x8xf32>
    %57 = vector.shape_cast %56 : vector<1x1x8xf32> to vector<1x8xf32>
    %c0_63 = arith.constant 0 : index
    %c2_64 = arith.constant 2 : index
    %c8_65 = arith.constant 8 : index
    %c0_66 = arith.constant 0 : index
    %58 = vector.load %arg11[%c0_63, %c2_64, %c8_65, %c0_66] : memref<1x18x25x8xf32, #tpu.memory_space<vmem>>, vector<1x16x16x8xf32>
    %59 = vector.shape_cast %57 : vector<1x8xf32> to vector<1x1x1x8xf32>
    %60 = vector.broadcast %59 : vector<1x1x1x8xf32> to vector<1x16x16x8xf32>
    %61 = arith.mulf %58, %60 : vector<1x16x16x8xf32>
    %62 = arith.addf %55, %61 : vector<1x16x16x8xf32>
    %c2_67 = arith.constant 2 : index
    %c2_68 = arith.constant 2 : index
    %c0_69 = arith.constant 0 : index
    %63 = vector.load %arg2[%c2_67, %c2_68, %c0_69] : memref<3x3x8xf32, #tpu.memory_space<vmem>>, vector<1x1x8xf32>
    %64 = vector.shape_cast %63 : vector<1x1x8xf32> to vector<1x8xf32>
    %c0_70 = arith.constant 0 : index
    %c2_71 = arith.constant 2 : index
    %c9_72 = arith.constant 9 : index
    %c0_73 = arith.constant 0 : index
    %65 = vector.load %arg11[%c0_70, %c2_71, %c9_72, %c0_73] : memref<1x18x25x8xf32, #tpu.memory_space<vmem>>, vector<1x16x16x8xf32>
    %66 = vector.shape_cast %64 : vector<1x8xf32> to vector<1x1x1x8xf32>
    %67 = vector.broadcast %66 : vector<1x1x1x8xf32> to vector<1x16x16x8xf32>
    %68 = arith.mulf %65, %67 : vector<1x16x16x8xf32>
    %69 = arith.addf %62, %68 : vector<1x16x16x8xf32>
    %70 = vector.shape_cast %69 : vector<1x16x16x8xf32> to vector<256x8xf32>
    %c0_74 = arith.constant 0 : index
    %c0_75 = arith.constant 0 : index
    %71 = vector.load %arg3[%c0_74, %c0_75] : memref<1x8xf32, #tpu.memory_space<vmem>>, vector<1x8xf32>
    %72 = vector.broadcast %71 : vector<1x8xf32> to vector<256x8xf32>
    %73 = arith.addf %70, %72 : vector<256x8xf32>
    %cst_76 = arith.constant 5.000000e-01 : f32
    %74 = vector.broadcast %cst_76 : f32 to vector<256x8xf32>
    %75 = arith.mulf %74, %73 : vector<256x8xf32>
    %cst_77 = arith.constant 0.707106769 : f32
    %76 = vector.broadcast %cst_77 : f32 to vector<256x8xf32>
    %77 = arith.mulf %73, %76 : vector<256x8xf32>
    %78 = math.erf %77 : vector<256x8xf32>
    %cst_78 = arith.constant 1.000000e+00 : f32
    %79 = vector.broadcast %cst_78 : f32 to vector<256x8xf32>
    %80 = arith.addf %79, %78 : vector<256x8xf32>
    %81 = arith.mulf %75, %80 : vector<256x8xf32>
    %c0_79 = arith.constant 0 : index
    %c0_80 = arith.constant 0 : index
    %82 = vector.load %arg4[%c0_79, %c0_80] : memref<32x8xf32, #tpu.memory_space<vmem>>, vector<32x8xf32>
    %cst_81 = arith.constant dense<0.000000e+00> : vector<32x256xf32>
    %83 = tpu.matmul %82, %81, %cst_81 {dimension_numbers = #tpu.dot_dimension_numbers<[1], [1], [0], [0], [0, 0, 1, 0], [], []>} : vector<32x8xf32>, vector<256x8xf32>, vector<32x256xf32> -> vector<32x256xf32>
    %c0_82 = arith.constant 0 : index
    %c0_83 = arith.constant 0 : index
    %84 = vector.load %arg5[%c0_82, %c0_83] : memref<32x1xf32, #tpu.memory_space<vmem>>, vector<32x1xf32>
    %85 = vector.broadcast %84 : vector<32x1xf32> to vector<32x256xf32>
    %86 = arith.addf %83, %85 : vector<32x256xf32>
    %cst_84 = arith.constant 5.000000e-01 : f32
    %87 = vector.broadcast %cst_84 : f32 to vector<32x256xf32>
    %88 = arith.mulf %87, %86 : vector<32x256xf32>
    %cst_85 = arith.constant 0.707106769 : f32
    %89 = vector.broadcast %cst_85 : f32 to vector<32x256xf32>
    %90 = arith.mulf %86, %89 : vector<32x256xf32>
    %91 = math.erf %90 : vector<32x256xf32>
    %cst_86 = arith.constant 1.000000e+00 : f32
    %92 = vector.broadcast %cst_86 : f32 to vector<32x256xf32>
    %93 = arith.addf %92, %91 : vector<32x256xf32>
    %94 = arith.mulf %88, %93 : vector<32x256xf32>
    %c0_87 = arith.constant 0 : index
    %c0_88 = arith.constant 0 : index
    %95 = vector.load %arg6[%c0_87, %c0_88] : memref<4x32xf32, #tpu.memory_space<vmem>>, vector<4x32xf32>
    %cst_89 = arith.constant dense<0.000000e+00> : vector<4x256xf32>
    %96 = tpu.matmul %95, %94, %cst_89 {dimension_numbers = #tpu.dot_dimension_numbers<[1], [0], [0], [1], [0, 0, 1, 1], [], []>} : vector<4x32xf32>, vector<32x256xf32>, vector<4x256xf32> -> vector<4x256xf32>
    %c0_90 = arith.constant 0 : index
    %c0_91 = arith.constant 0 : index
    %97 = vector.load %arg7[%c0_90, %c0_91] : memref<4x1xf32, #tpu.memory_space<vmem>>, vector<4x1xf32>
    %98 = vector.broadcast %97 : vector<4x1xf32> to vector<4x256xf32>
    %99 = arith.addf %96, %98 : vector<4x256xf32>
    %cst_92 = arith.constant 5.000000e-01 : f32
    %100 = vector.broadcast %cst_92 : f32 to vector<4x256xf32>
    %101 = arith.mulf %100, %99 : vector<4x256xf32>
    %cst_93 = arith.constant 0.707106769 : f32
    %102 = vector.broadcast %cst_93 : f32 to vector<4x256xf32>
    %103 = arith.mulf %99, %102 : vector<4x256xf32>
    %104 = math.erf %103 : vector<4x256xf32>
    %cst_94 = arith.constant 1.000000e+00 : f32
    %105 = vector.broadcast %cst_94 : f32 to vector<4x256xf32>
    %106 = arith.addf %105, %104 : vector<4x256xf32>
    %107 = arith.mulf %101, %106 : vector<4x256xf32>
    %c0_95 = arith.constant 0 : index
    %c0_96 = arith.constant 0 : index
    %108 = vector.load %arg8[%c0_95, %c0_96] : memref<4x4xf32, #tpu.memory_space<vmem>>, vector<4x4xf32>
    %cst_97 = arith.constant dense<0.000000e+00> : vector<4x256xf32>
    %109 = tpu.matmul %108, %107, %cst_97 {dimension_numbers = #tpu.dot_dimension_numbers<[1], [0], [0], [1], [0, 0, 1, 1], [], []>} : vector<4x4xf32>, vector<4x256xf32>, vector<4x256xf32> -> vector<4x256xf32>
    %c0_98 = arith.constant 0 : index
    %c0_99 = arith.constant 0 : index
    %110 = vector.load %arg9[%c0_98, %c0_99] : memref<4x1xf32, #tpu.memory_space<vmem>>, vector<4x1xf32>
    %111 = vector.broadcast %110 : vector<4x1xf32> to vector<4x256xf32>
    %112 = arith.addf %109, %111 : vector<4x256xf32>
    %113 = arith.negf %112 : vector<4x256xf32>
    %114 = math.exp %113 : vector<4x256xf32>
    %cst_100 = arith.constant 1.000000e+00 : f32
    %115 = vector.broadcast %cst_100 : f32 to vector<4x256xf32>
    %116 = arith.addf %115, %114 : vector<4x256xf32>
    %117 = arith.divf %115, %116 : vector<4x256xf32>
    %118 = arith.mulf %107, %117 : vector<4x256xf32>
    %cst_101 = arith.constant dense<0.000000e+00> : vector<256xf32>
    %119 = vector.multi_reduction <add>, %118, %cst_101 [0] : vector<4x256xf32> to vector<256xf32>
    %120 = vector.shape_cast %119 : vector<256xf32> to vector<1x256xf32>
    %c0_102 = arith.constant 0 : index
    %c0_103 = arith.constant 0 : index
    %c0_104 = arith.constant 0 : index
    %121 = vector.load %arg10[%c0_102, %c0_103, %c0_104] : memref<1x1x256xf32, #tpu.memory_space<vmem>>, vector<1x1x256xf32>
    %122 = vector.shape_cast %121 : vector<1x1x256xf32> to vector<1x256xf32>
    %123 = vector.shape_cast %120 : vector<1x256xf32> to vector<1x1x256xf32>
    tpu.vector_store %arg10[%c0_102, %c0_103, %c0_104], %123 {strides = array<i32>} : memref<1x1x256xf32, #tpu.memory_space<vmem>>, vector<1x1x256xf32>,
    return
  }
  func.func @transform_0(%arg0: i32) -> (i32, i32, i32, i32) {
    %c0_i32 = arith.constant 0 : i32
    %c0_i32_0 = arith.constant 0 : i32
    %c0_i32_1 = arith.constant 0 : i32
    %c0_i32_2 = arith.constant 0 : i32
    return %arg0, %c0_i32, %c0_i32_0, %c0_i32_1 : i32, i32, i32, i32
  }
  func.func @transform_1(%arg0: i32) -> (i32, i32, i32) {
    %c0_i32 = arith.constant 0 : i32
    %c0_i32_0 = arith.constant 0 : i32
    %c0_i32_1 = arith.constant 0 : i32
    %c0_i32_2 = arith.constant 0 : i32
    return %c0_i32, %c0_i32_0, %c0_i32_1 : i32, i32, i32
  }
  func.func @transform_2(%arg0: i32) -> (i32, i32) {
    %c0_i32 = arith.constant 0 : i32
    %c0_i32_0 = arith.constant 0 : i32
    %c0_i32_1 = arith.constant 0 : i32
    return %c0_i32, %c0_i32_0 : i32, i32
  }
  func.func @transform_3(%arg0: i32) -> (i32, i32) {
    %c0_i32 = arith.constant 0 : i32
    %c0_i32_0 = arith.constant 0 : i32
    %c0_i32_1 = arith.constant 0 : i32
    return %c0_i32, %c0_i32_0 : i32, i32
  }
  func.func @transform_4(%arg0: i32) -> (i32, i32) {
    %c0_i32 = arith.constant 0 : i32
    %c0_i32_0 = arith.constant 0 : i32
    %c0_i32_1 = arith.constant 0 : i32
    return %c0_i32, %c0_i32_0 : i32, i32
  }
  func.func @transform_5(%arg0: i32) -> (i32, i32) {
    %c0_i32 = arith.constant 0 : i32
    %c0_i32_0 = arith.constant 0 : i32
    %c0_i32_1 = arith.constant 0 : i32
    return %c0_i32, %c0_i32_0 : i32, i32
  }
  func.func @transform_6(%arg0: i32) -> (i32, i32) {
    %c0_i32 = arith.constant 0 : i32
    %c0_i32_0 = arith.constant 0 : i32
    %c0_i32_1 = arith.constant 0 : i32
    return %c0_i32, %c0_i32_0 : i32, i32
  }
  func.func @transform_7(%arg0: i32) -> (i32, i32) {
    %c0_i32 = arith.constant 0 : i32
    %c0_i32_0 = arith.constant 0 : i32
    %c0_i32_1 = arith.constant 0 : i32
    return %c0_i32, %c0_i32_0 : i32, i32
  }
  func.func @transform_8(%arg0: i32) -> (i32, i32) {
    %c0_i32 = arith.constant 0 : i32
    %c0_i32_0 = arith.constant 0 : i32
    %c0_i32_1 = arith.constant 0 : i32
    return %c0_i32, %c0_i32_0 : i32, i32
  }
  func.func @transform_9(%arg0: i32) -> (i32, i32, i32) {
    %c0_i32 = arith.constant 0 : i32
    %c0_i32_0 = arith.constant 0 : i32
    %c0_i32_1 = arith.constant 0 : i32
    return %arg0, %c0_i32, %c0_i32_0 : i32, i32, i32
  }
}

</mosaic_0001>

<bundles_post_ra>
// kernel: tpu_custom_call.1
= control target key start
LH: loop header
LB: loop body
LE: loop exit
PB: predicated region body
PF: predicated region fallthrough
CT: control target
= control target key end

     0   :  { %14 = vsyncpa [#allocation4], 0  ;;  %s4225_s0 = inlined_call_operand.vmem [shape: f32[2,16,16,4], index: 0, kind: input, shape index: {}]   ;;  %s4226_s1 = inlined_call_operand.vmem [shape: f32[3,3,8], index: 1, kind: input, shape index: {}]   ;;  %s4227_s2 = inlined_call_operand.vmem [shape: f32[1,8], index: 2, kind: input, shape index: {}]   ;;  %s4228_s3 = inlined_call_operand.vmem [shape: f32[32,8], index: 3, kind: input, shape index: {}]   ;;  %s4229_s4 = inlined_call_operand.vmem [shape: f32[32,1], index: 4, kind: input, shape index: {}]   ;;  %s4230_s5 = inlined_call_operand.vmem [shape: f32[4,32], index: 5, kind: input, shape index: {}]   ;;  %s4231_s6 = inlined_call_operand.vmem [shape: f32[4,1], index: 6, kind: input, shape index: {}]   ;;  %s4232_s7 = inlined_call_operand.vmem [shape: f32[4,4], index: 7, kind: input, shape index: {}]   ;;  %s4233_s8 = inlined_call_operand.vmem [shape: f32[4,1], index: 8, kind: input, shape index: {}]   ;;  %s4234_s9 = inlined_call_operand.hbm [shape: f32[2,1,256], index: 9, kind: output, shape index: {}]  }
   0x1   :  { %16 = vsyncpa [#allocation4 + $0x1], 0  ;;  %s2748_s30 = smov 0   ;;  %s2750_s10 = smov 0  }
   0x2   :  { %s2752_s11 = smov 0   ;;  %s2754_s12 = smov 0  }
   0x3 LB: > { %s2769_s13 = sadd.s32 4294967295, %s2691_s12   ;;  %s2312_s14 = sadd.s32 4294967294, %s2691_s12   ;;  %s2691_s12 = sphi %s2754_s12, %s4262_s12   ;;  %s2687_s11 = sphi %s2752_s11, %s4261_s11   ;;  %s2683_s10 = sphi %s2750_s10, %s4260_s10   ;;  %s2679_s30 = sphi %s2748_s30, %s4259_s30  }
   0x4   : > { %s2773_s15 = sadd.s32 1, %s2691_s12   ;;  %s223_s16 = sadd.s32 1, %s2687_s11 }
   0x5   : > { %s220_s17 = ssub.s32 %s2691_s12, %s2773_s15  ;;  %p233_p0 = scmp.ne.s32.totalorder %s2687_s11, %s2683_s10 }
   0x6   : > { %p221_p1 = scmp.eq.s32.totalorder %s220_s17, 0  ;;  %p234_p2 = scmp.eq.s32.totalorder %s2769_s13, 1 }
   0x7   : > { %p239_p3 = scmp.ne.s32.totalorder %s2683_s10, %s2679_s30  ;;  %p240_p4 = scmp.eq.s32.totalorder %s2312_s14, 1 }
   0x8   : > { %s2784_s18 = scalar_select %p221_p1, %s2687_s11, %s223_s16  }
   0x9   : > { %p2786_p5 = por %p234_p2, %p233_p0  ;;  %p2790_p6 = por %p240_p4, %p239_p3 }
   0xa   : > { %p2315_p7 = scmp.ge.s32.totalorder %s2691_s12, 1  ;;  %p290_p8 = scmp.lt.s32.totalorder %s2691_s12, 3 }
   0xc   : > { %p291_p9 = pnand %p2315_p7, %p290_p8 }
   0xe   : > { %294 = sbr.rel (%p291_p9) target bundleno = 1136 (0x470), region = 56 }
  0x15   : > { %p326_p10 = scmp.lt.s32.totalorder %s2769_s13, 1  ;;  %vm331_vm0 = vcmask 64512   ;;  %vm335_vm1 = vcmask 57344   ;;  %v4235_v0 = vmov 0.0   ;;  %s2694_s26 = smov 4   ;;  %vm565_vm2 = vcmask 31744  }
  0x16   : > { %370 = vst.msk [vmem:[#allocation2 + $0x128] sm:$0xff] %vm331_vm0, %v4235_v0  ;;  %332 = vst.msk [vmem:[#allocation2] sm:$0xff] %vm331_vm0, %v4235_v0  ;;  %2082 = vmatprep.mubr.f32.mxu1 %v4235_v0  ;;  %v3119_v41 = vld [vmem:[%s4226_s1] ss:$0 sm:$0xff]  ;;  %v3124_v42 = vld [vmem:[%s4226_s1 + $0x1] ss:$0 sm:$0xff] }
  0x17   : > { %333 = vst.msk [vmem:[#allocation2 + $0x8] sm:$0xff] %vm331_vm0, %v4235_v0  ;;  %334 = vst.msk [vmem:[#allocation2 + $0x10] sm:$0xff] %vm331_vm0, %v4235_v0  ;;  %s327_s21 = scalar_select %p326_p10, %s2769_s13, 1  ;;  %v3139_v53 = vld [vmem:[%s4226_s1 + $0x2] ss:$0 sm:$0xff]  ;;  %vm2014_vm4 = vcmask 261120  }
  0x18   : > { %337 = vst.msk [vmem:[#allocation2 + $0x20] sm:$0xff] %vm331_vm0, %v4235_v0  ;;  %338 = vst.msk [vmem:[#allocation2 + $0x28] sm:$0xff] %vm331_vm0, %v4235_v0  ;;  %vm2109_vm5 = vcmask 1043456   ;;  %s2383_s23 = sshll.u32 %s2769_s13, 5  ;;  %s2697_s13 = smov [#allocation3]  }
  0x19   : > { %339 = vst.msk [vmem:[#allocation2 + $0x30] sm:$0xff] %vm331_vm0, %v4235_v0  ;;  %341 = vst.msk [vmem:[#allocation2 + $0x40] sm:$0xff] %vm331_vm0, %v4235_v0  ;;  %s2382_s22 = sshll.u32 %s327_s21, 8  ;;  %s323_s21 = sand.u32 1, %s2683_s10  }
  0x1a   : > { %342 = vst.msk [vmem:[#allocation2 + $0x48] sm:$0xff] %vm331_vm0, %v4235_v0  ;;  %343 = vst.msk [vmem:[#allocation2 + $0x50] sm:$0xff] %vm331_vm0, %v4235_v0  ;;  %s2948_s25 = scalar_lea.vmem %s4225_s0, %s2382_s22  ;;  %s2316_s22 = sshll.u32 %s323_s21, 1 }
  0x1b   : > { %345 = vst.msk [vmem:[#allocation2 + $0x60] sm:$0xff] %vm331_vm0, %v4235_v0  ;;  %346 = vst.msk [vmem:[#allocation2 + $0x68] sm:$0xff] %vm331_vm0, %v4235_v0  ;;  %v2951_v1 = vld [vmem:[%s2948_s25 + $0x80] sm:$0xff]  ;;  %v2954_v2 = vld [vmem:[%s2948_s25 + $0x70] sm:$0xff]  ;;  %s325_s24 = scalar_lea.vmem [#allocation3], %s2316_s22  ;;  %s4183_s28 = scalar_lea.hbm %s4234_s9, %s2383_s23 }
  0x1c   : > { %347 = vst.msk [vmem:[#allocation2 + $0x70] sm:$0xff] %vm331_vm0, %v4235_v0  ;;  %349 = vst.msk [vmem:[#allocation2 + $0x80] sm:$0xff] %vm331_vm0, %v4235_v0  ;;  %501 = vrot.lane.b32.xlu1 %v2951_v1, %s2694_s26  ;;  %497 = vrot.lane.b32.xlu0 %v2954_v2, %s2694_s26  ;;  %v2961_v3 = vld [vmem:[%s2948_s25 + $0x88] sm:$0xff]  ;;  %v2964_v4 = vld [vmem:[%s2948_s25 + $0x78] sm:$0xff]  ;;  %s2239_s29 = scalar_lea.sflag [#allocation4], %s323_s21  ;;  %s2633_s16 = sshll.u32 %s2697_s13, 4  ;;  %s2634_s16 = int_to_ptr.vmem [resolvable:$false] %s2633_s16 }
  0x1d   : > { %350 = vst.msk [vmem:[#allocation2 + $0x88] sm:$0xff] %vm331_vm0, %v4235_v0  ;;  %351 = vst.msk [vmem:[#allocation2 + $0x90] sm:$0xff] %vm331_vm0, %v4235_v0  ;;  %v2971_v5 = vld [vmem:[%s2948_s25 + $0x8] sm:$0xff]  ;;  %v2974_v6 = vld [vmem:[%s2948_s25] sm:$0xff]  ;;  %s2635_s17 = scalar_lea.vmem %s2634_s16, 64 }
  0x1e   : > { %353 = vst.msk [vmem:[#allocation2 + $0xa0] sm:$0xff] %vm331_vm0, %v4235_v0  ;;  %354 = vst.msk [vmem:[#allocation2 + $0xa8] sm:$0xff] %vm331_vm0, %v4235_v0  ;;  %v2981_v7 = vld [vmem:[%s2948_s25 + $0x98] sm:$0xff]  ;;  %v2984_v8 = vld [vmem:[%s2948_s25 + $0x90] sm:$0xff] }
  0x1f   : > { %355 = vst.msk [vmem:[#allocation2 + $0xb0] sm:$0xff] %vm331_vm0, %v4235_v0  ;;  %357 = vst.msk [vmem:[#allocation2 + $0xc0] sm:$0xff] %vm331_vm0, %v4235_v0  ;;  %v2991_v9 = vld [vmem:[%s2948_s25 + $0x18] sm:$0xff]  ;;  %v2994_v10 = vld [vmem:[%s2948_s25 + $0x10] sm:$0xff] }
  0x20   : > { %358 = vst.msk [vmem:[#allocation2 + $0xc8] sm:$0xff] %vm331_vm0, %v4235_v0  ;;  %359 = vst.msk [vmem:[#allocation2 + $0xd0] sm:$0xff] %vm331_vm0, %v4235_v0  ;;  %503 = vrot.lane.b32.xlu1 %v2961_v3, %s2694_s26  ;;  %499 = vrot.lane.b32.xlu0 %v2964_v4, %s2694_s26  ;;  %v3001_v11 = vld [vmem:[%s2948_s25 + $0xa8] sm:$0xff]  ;;  %v3004_v12 = vld [vmem:[%s2948_s25 + $0xa0] sm:$0xff] }
  0x21   : > { %361 = vst.msk [vmem:[#allocation2 + $0xe0] sm:$0xff] %vm331_vm0, %v4235_v0  ;;  %362 = vst.msk [vmem:[#allocation2 + $0xe8] sm:$0xff] %vm331_vm0, %v4235_v0  ;;  %v3011_v13 = vld [vmem:[%s2948_s25 + $0x28] sm:$0xff]  ;;  %v3014_v14 = vld [vmem:[%s2948_s25 + $0x20] sm:$0xff] }
  0x22   : > { %363 = vst.msk [vmem:[#allocation2 + $0xf0] sm:$0xff] %vm331_vm0, %v4235_v0  ;;  %365 = vst.msk [vmem:[#allocation2 + $0x100] sm:$0xff] %vm331_vm0, %v4235_v0  ;;  %v3021_v15 = vld [vmem:[%s2948_s25 + $0xb8] sm:$0xff]  ;;  %v3024_v16 = vld [vmem:[%s2948_s25 + $0xb0] sm:$0xff] }
  0x23   : > { %366 = vst.msk [vmem:[#allocation2 + $0x108] sm:$0xff] %vm331_vm0, %v4235_v0  ;;  %367 = vst.msk [vmem:[#allocation2 + $0x110] sm:$0xff] %vm331_vm0, %v4235_v0  ;;  %v3031_v17 = vld [vmem:[%s2948_s25 + $0x38] sm:$0xff]  ;;  %v3034_v18 = vld [vmem:[%s2948_s25 + $0x30] sm:$0xff] }
  0x24   : > { %369 = vst.msk [vmem:[#allocation2 + $0x120] sm:$0xff] %vm331_vm0, %v4235_v0  ;;  %371 = vst.msk [vmem:[#allocation2 + $0x130] sm:$0xff] %vm331_vm0, %v4235_v0  ;;  %471 = vrot.lane.b32.xlu1 %v2971_v5, %s2694_s26  ;;  %469 = vrot.lane.b32.xlu0 %v2974_v6, %s2694_s26  ;;  %v3041_v19 = vld [vmem:[%s2948_s25 + $0xc8] sm:$0xff]  ;;  %v3044_v20 = vld [vmem:[%s2948_s25 + $0xc0] sm:$0xff] }
  0x25   : > { %373 = vst.msk [vmem:[#allocation2 + $0x140] sm:$0xff] %vm331_vm0, %v4235_v0  ;;  %374 = vst.msk [vmem:[#allocation2 + $0x148] sm:$0xff] %vm331_vm0, %v4235_v0  ;;  %v3051_v21 = vld [vmem:[%s2948_s25 + $0x48] sm:$0xff]  ;;  %v3054_v22 = vld [vmem:[%s2948_s25 + $0x40] sm:$0xff] }
  0x26   : > { %375 = vst.msk [vmem:[#allocation2 + $0x150] sm:$0xff] %vm331_vm0, %v4235_v0  ;;  %377 = vst.msk [vmem:[#allocation2 + $0x160] sm:$0xff] %vm331_vm0, %v4235_v0  ;;  %v3061_v23 = vld [vmem:[%s2948_s25 + $0xd8] sm:$0xff]  ;;  %v3064_v24 = vld [vmem:[%s2948_s25 + $0xd0] sm:$0xff] }
  0x27   : > { %378 = vst.msk [vmem:[#allocation2 + $0x168] sm:$0xff] %vm331_vm0, %v4235_v0  ;;  %379 = vst.msk [vmem:[#allocation2 + $0x170] sm:$0xff] %vm331_vm0, %v4235_v0  ;;  %v3071_v25 = vld [vmem:[%s2948_s25 + $0x58] sm:$0xff]  ;;  %v3074_v26 = vld [vmem:[%s2948_s25 + $0x50] sm:$0xff] }
  0x28   : > { %381 = vst.msk [vmem:[#allocation2 + $0x180] sm:$0xff] %vm331_vm0, %v4235_v0  ;;  %382 = vst.msk [vmem:[#allocation2 + $0x188] sm:$0xff] %vm331_vm0, %v4235_v0  ;;  %507 = vrot.lane.b32.xlu1 %v2981_v7, %s2694_s26  ;;  %505 = vrot.lane.b32.xlu0 %v2984_v8, %s2694_s26  ;;  %v3081_v27 = vld [vmem:[%s2948_s25 + $0xe8] sm:$0xff]  ;;  %v3084_v28 = vld [vmem:[%s2948_s25 + $0xe0] sm:$0xff] }
  0x29   : > { %383 = vst.msk [vmem:[#allocation2 + $0x190] sm:$0xff] %vm331_vm0, %v4235_v0  ;;  %385 = vst.msk [vmem:[#allocation2 + $0x1a0] sm:$0xff] %vm331_vm0, %v4235_v0  ;;  %v3091_v29 = vld [vmem:[%s2948_s25 + $0x68] sm:$0xff]  ;;  %v3094_v30 = vld [vmem:[%s2948_s25 + $0x60] sm:$0xff] }
  0x2a   : > { %386 = vst.msk [vmem:[#allocation2 + $0x1a8] sm:$0xff] %vm331_vm0, %v4235_v0  ;;  %387 = vst.msk [vmem:[#allocation2 + $0x1b0] sm:$0xff] %vm331_vm0, %v4235_v0  ;;  %v3101_v31 = vld [vmem:[%s2948_s25 + $0xf8] sm:$0xff]  ;;  %v3104_v32 = vld [vmem:[%s2948_s25 + $0xf0] sm:$0xff]  ;;  %s2253_s25 = sshll.u32 %s325_s24, 4  ;;  %s4185_s25 = int_to_ptr.vmem [resolvable:$true] %s2253_s25 }
  0x2b   : > { %389 = vst.msk [vmem:[#allocation2 + $0x1c0] sm:$0xff] %vm331_vm0, %v4235_v0  ;;  %390 = vst.msk [vmem:[#allocation2 + $0x1c8] sm:$0xff] %vm331_vm0, %v4235_v0  ;;  %v632_v35 = vld [vmem:[#allocation2 + $0x7] sm:$0xff]  ;;  %v633_v38 = vld [vmem:[#allocation2 + $0xf] sm:$0xff]  ;;  %s2629_s14 = scalar_lea.vmem %s4185_s25, 32  ;;  %p2636_p0 = scmp.lt.s32.totalorder %s4185_s25, %s2634_s16 }
  0x2c   : > { %391 = vst.msk [vmem:[#allocation2 + $0x1d0] sm:$0xff] %vm331_vm0, %v4235_v0  ;;  %393 = vst.msk [vmem:[#allocation2 + $0x1e0] sm:$0xff] %vm331_vm0, %v4235_v0  ;;  %475 = vrot.lane.b32.xlu1 %v2991_v9, %s2694_s26  ;;  %473 = vrot.lane.b32.xlu0 %v2994_v10, %s2694_s26  ;;  %v733_v39 = vld [vmem:[#allocation2 + $0x8] sm:$0xff]  ;;  %v734_v40 = vld [vmem:[#allocation2 + $0x10] sm:$0xff]  ;;  %v668_v45 = vmul.f32 %v3119_v41, %v632_v35  ;;  %v669_v46 = vmul.f32 %v3119_v41, %v633_v38  ;;  %p2630_p11 = scmp.ne.s32.totalorder %s4185_s25, %s2629_s14  ;;  %p2637_p1 = scmp.lt.s32.totalorder %s2635_s17, %s2629_s14 }
  0x2d   : > { %394 = vst.msk [vmem:[#allocation2 + $0x1e8] sm:$0xff] %vm331_vm0, %v4235_v0  ;;  %395 = vst.msk [vmem:[#allocation2 + $0x1f0] sm:$0xff] %vm331_vm0, %v4235_v0  ;;  %v769_v47 = vmul.f32 %v3124_v42, %v733_v39  ;;  %v770_v48 = vmul.f32 %v3124_v42, %v734_v40  ;;  %v834_v51 = vld [vmem:[#allocation2 + $0x9] sm:$0xff]  ;;  %v3171_v38 = vld [vmem:[%s4226_s1 + $0x8] ss:$0 sm:$0xff] }
  0x2e   : > { %397 = vst.msk [vmem:[#allocation2 + $0x200] sm:$0xff] %vm331_vm0, %v4235_v0  ;;  %398 = vst.msk [vmem:[#allocation2 + $0x208] sm:$0xff] %vm331_vm0, %v4235_v0  ;;  %v870_v58 = vmul.f32 %v3139_v53, %v834_v51  ;;  %p2631_p12 = pnand %p2630_p11, %p2786_p5  ;;  %p2638_p2 = por %p2637_p1, %p2636_p0 }
  0x2f   : > { %399 = vst.msk [vmem:[#allocation2 + $0x210] sm:$0xff] %vm331_vm0, %v4235_v0  ;;  %401 = vst.msk [vmem:[#allocation2 + $0x220] sm:$0xff] %vm331_vm0, %v4235_v0  ;;  %v801_v56 = vadd.f32 %v769_v47, %v668_v45  ;;  %v802_v57 = vadd.f32 %v770_v48, %v669_v46 }
  0x30   : > { %402 = vst.msk [vmem:[#allocation2 + $0x228] sm:$0xff] %vm331_vm0, %v4235_v0  ;;  %403 = vst.msk [vmem:[#allocation2 + $0x230] sm:$0xff] %vm331_vm0, %v4235_v0  ;;  %511 = vrot.lane.b32.xlu1 %v3001_v11, %s2694_s26  ;;  %509 = vrot.lane.b32.xlu0 %v3004_v12, %s2694_s26  ;;  %p2632_p13 = pneg %p2631_p12 }
  0x31   : > { %368 = vst.msk [vmem:[#allocation2 + $0x118] sm:$0x1] %vm335_vm1, %v4235_v0  ;;  %372 = vst.msk [vmem:[#allocation2 + $0x138] sm:$0x1] %vm335_vm1, %v4235_v0  ;;  %v902_v39 = vadd.f32 %v870_v58, %v801_v56 }
  0x32   : > { %376 = vst.msk [vmem:[#allocation2 + $0x158] sm:$0x1] %vm335_vm1, %v4235_v0  ;;  %336 = vst.msk [vmem:[#allocation2 + $0x18] sm:$0x1] %vm335_vm1, %v4235_v0  ;;  %p2639_p3 = pnand %p2638_p2, %p2632_p13 }
  0x33   : > { %340 = vst.msk [vmem:[#allocation2 + $0x38] sm:$0x1] %vm335_vm1, %v4235_v0  ;;  %344 = vst.msk [vmem:[#allocation2 + $0x58] sm:$0x1] %vm335_vm1, %v4235_v0 }
  0x34   : > { %348 = vst.msk [vmem:[#allocation2 + $0x78] sm:$0x1] %vm335_vm1, %v4235_v0  ;;  %352 = vst.msk [vmem:[#allocation2 + $0x98] sm:$0x1] %vm335_vm1, %v4235_v0  ;;  %479 = vrot.lane.b32.xlu1 %v3011_v13, %s2694_s26  ;;  %477 = vrot.lane.b32.xlu0 %v3014_v14, %s2694_s26 }
  0x35   : > { %356 = vst.msk [vmem:[#allocation2 + $0xb8] sm:$0x1] %vm335_vm1, %v4235_v0  ;;  %360 = vst.msk [vmem:[#allocation2 + $0xd8] sm:$0x1] %vm335_vm1, %v4235_v0 }
  0x36   : > { %364 = vst.msk [vmem:[#allocation2 + $0xf8] sm:$0x1] %vm335_vm1, %v4235_v0  ;;  %380 = vst.msk [vmem:[#allocation2 + $0x178] sm:$0x1] %vm335_vm1, %v4235_v0 }
  0x37   : > { %384 = vst.msk [vmem:[#allocation2 + $0x198] sm:$0x1] %vm335_vm1, %v4235_v0  ;;  %388 = vst.msk [vmem:[#allocation2 + $0x1b8] sm:$0x1] %vm335_vm1, %v4235_v0 }
  0x38   : > { %392 = vst.msk [vmem:[#allocation2 + $0x1d8] sm:$0x1] %vm335_vm1, %v4235_v0  ;;  %396 = vst.msk [vmem:[#allocation2 + $0x1f8] sm:$0x1] %vm335_vm1, %v4235_v0  ;;  %515 = vrot.lane.b32.xlu1 %v3021_v15, %s2694_s26  ;;  %513 = vrot.lane.b32.xlu0 %v3024_v16, %s2694_s26 }
  0x39   : > { %400 = vst.msk [vmem:[#allocation2 + $0x218] sm:$0x1] %vm335_vm1, %v4235_v0  ;;  %404 = vst.msk [vmem:[#allocation2 + $0x238] sm:$0x1] %vm335_vm1, %v4235_v0  ;;  %v835_v52 = vld [vmem:[#allocation2 + $0x11] sm:$0xff] }
  0x3a   : > { %4244 = vst [vmem:[#allocation6_spill] sm:$0xff] %v3091_v29  ;;  %4245 = vst [vmem:[#allocation7_spill] sm:$0xff] %v3094_v30  ;;  %v871_v59 = vmul.f32 %v3139_v53, %v835_v52 }
  0x3b   : > { %4246 = vst [vmem:[#allocation8_spill] sm:$0xff] %v3101_v31  ;;  %4247 = vst [vmem:[#allocation9_spill] sm:$0xff] %v3104_v32 }
  0x3c   : > { %483 = vrot.lane.b32.xlu1 %v3031_v17, %s2694_s26  ;;  %481 = vrot.lane.b32.xlu0 %v3034_v18, %s2694_s26  ;;  %v903_v40 = vadd.f32 %v871_v59, %v802_v57  ;;  %vm3424_vm3 = vmpackc.low %vm331_vm0, %vm331_vm0 }
  0x40   : > { %519 = vrot.lane.b32.xlu1 %v3041_v19, %s2694_s26  ;;  %517 = vrot.lane.b32.xlu0 %v3044_v20, %s2694_s26 }
  0x44   : > { %487 = vrot.lane.b32.xlu1 %v3051_v21, %s2694_s26  ;;  %485 = vrot.lane.b32.xlu0 %v3054_v22, %s2694_s26 }
  0x48   : > { %523 = vrot.lane.b32.xlu1 %v3061_v23, %s2694_s26  ;;  %521 = vrot.lane.b32.xlu0 %v3064_v24, %s2694_s26 }
  0x4c   : > { %491 = vrot.lane.b32.xlu1 %v3071_v25, %s2694_s26  ;;  %489 = vrot.lane.b32.xlu0 %v3074_v26, %s2694_s26 }
  0x50   : > { %527 = vrot.lane.b32.xlu1 %v3081_v27, %s2694_s26  ;;  %525 = vrot.lane.b32.xlu0 %v3084_v28, %s2694_s26 }
  0x54   : > { %495 = vrot.lane.b32.xlu1 %v3091_v29, %s2694_s26  ;;  %493 = vrot.lane.b32.xlu0 %v3094_v30, %s2694_s26 }
  0x58   : > { %531 = vrot.lane.b32.xlu1 %v3101_v31, %s2694_s26  ;;  %529 = vrot.lane.b32.xlu0 %v3104_v32, %s2694_s26 }
  0x8e   : > { %v502_v33 = vpop.permute.xlu1 %501  ;;  %v498_v34 = vpop.permute.xlu0 %497 }
  0x8f   : > { %v582_v36 = vsel %vm565_vm2, %v2951_v1, %v502_v33  ;;  %v580_v37 = vsel %vm565_vm2, %v2954_v2, %v498_v34 }
  0x90   : > { %615 = vst.msk [vmem:[#allocation2 + $0x128] sm:$0xff] %vm331_vm0, %v582_v36  ;;  %613 = vst.msk [vmem:[#allocation2 + $0x108] sm:$0xff] %vm331_vm0, %v580_v37  ;;  %v3166_v37 = vld [vmem:[%s4226_s1 + $0x6] ss:$0 sm:$0xff] }
  0x92   : > { %v504_v43 = vpop.permute.xlu1 %503  ;;  %v500_v44 = vpop.permute.xlu0 %499 }
  0x93   : > { %v583_v49 = vsel %vm565_vm2, %v2961_v3, %v504_v43  ;;  %v581_v50 = vsel %vm565_vm2, %v2964_v4, %v500_v44  ;;  %v3154_v4 = vld [vmem:[%s4226_s1 + $0x4] ss:$0 sm:$0xff] }
  0x94   : > { %616 = vst.msk [vmem:[#allocation2 + $0x130] sm:$0xff] %vm331_vm0, %v583_v49  ;;  %614 = vst.msk [vmem:[#allocation2 + $0x110] sm:$0xff] %vm331_vm0, %v581_v50 }
  0x96   : > { %v472_v54 = vpop.permute.xlu1 %471  ;;  %v470_v55 = vpop.permute.xlu0 %469 }
  0x97   : > { %v567_v60 = vsel %vm565_vm2, %v2971_v5, %v472_v54  ;;  %v566_v61 = vsel %vm565_vm2, %v2974_v6, %v470_v55  ;;  %v648_v62 = vld [vmem:[#allocation2 + $0x107] sm:$0xff]  ;;  %v3159_v5 = vld [vmem:[%s4226_s1 + $0x5] ss:$0 sm:$0xff] }
  0x98   : > { %v749_v63 = vld [vmem:[#allocation2 + $0x108] sm:$0xff]  ;;  %600 = vst.msk [vmem:[#allocation2 + $0x30] sm:$0xff] %vm331_vm0, %v567_v60  ;;  %599 = vst.msk [vmem:[#allocation2 + $0x28] sm:$0xff] %vm331_vm0, %v566_v61  ;;  %v684_v2 = vmul.f32 %v3119_v41, %v648_v62 }
  0x99   : > { %v952_v1 = vld [vmem:[#allocation2 + $0x127] sm:$0xff]  ;;  %v785_v3 = vmul.f32 %v3124_v42, %v749_v63 }
  0x9a   : > { %v1053_v6 = vld [vmem:[#allocation2 + $0x128] sm:$0xff]  ;;  %v686_v33 = vmul.f32 %v3119_v41, %v952_v1  ;;  %v508_v35 = vpop.permute.xlu1 %507  ;;  %v506_v36 = vpop.permute.xlu0 %505  ;;  %v988_v49 = vmul.f32 %v3154_v4, %v952_v1 }
  0x9b   : > { %v787_v34 = vmul.f32 %v3124_v42, %v1053_v6  ;;  %v1253_v43 = vld [vmem:[#allocation2 + $0x107] sm:$0xff]  ;;  %v585_v44 = vsel %vm565_vm2, %v2981_v7, %v508_v35  ;;  %v584_v45 = vsel %vm565_vm2, %v2984_v8, %v506_v36  ;;  %v649_v46 = vld [vmem:[#allocation2 + $0x10f] sm:$0xff]  ;;  %v1089_v50 = vmul.f32 %v3159_v5, %v1053_v6 }
  0x9c   : > { %v750_v47 = vld [vmem:[#allocation2 + $0x110] sm:$0xff]  ;;  %618 = vst.msk [vmem:[#allocation2 + $0x150] sm:$0xff] %vm331_vm0, %v585_v44  ;;  %617 = vst.msk [vmem:[#allocation2 + $0x148] sm:$0xff] %vm331_vm0, %v584_v45  ;;  %v685_v51 = vmul.f32 %v3119_v41, %v649_v46  ;;  %v817_v54 = vadd.f32 %v785_v3, %v684_v2  ;;  %v3189_v61 = vmul.f32 %v3171_v38, %v1253_v43 }
  0x9d   : > { %v850_v48 = vld [vmem:[#allocation2 + $0x109] sm:$0xff]  ;;  %v786_v52 = vmul.f32 %v3124_v42, %v750_v47  ;;  %v851_v7 = vld [vmem:[#allocation2 + $0x111] sm:$0xff]  ;;  %v3186_v60 = vadd.f32 %v787_v34, %v686_v33 }
  0x9e   : > { %v886_v55 = vmul.f32 %v3139_v53, %v850_v48  ;;  %v953_v8 = vld [vmem:[#allocation2 + $0x12f] sm:$0xff]  ;;  %v887_v57 = vmul.f32 %v3139_v53, %v851_v7  ;;  %4248 = vst [vmem:[#allocation10_spill] sm:$0xff] %v3189_v61  ;;  %v476_v62 = vpop.permute.xlu1 %475  ;;  %v474_v63 = vpop.permute.xlu0 %473 }
  0x9f   : > { %v1054_v56 = vld [vmem:[#allocation2 + $0x130] sm:$0xff]  ;;  %v989_v58 = vmul.f32 %v3154_v4, %v953_v8  ;;  %v818_v1 = vadd.f32 %v786_v52, %v685_v51  ;;  %v687_v35 = vmul.f32 %v3119_v41, %v953_v8  ;;  %v569_v36 = vsel %vm565_vm2, %v2991_v9, %v476_v62  ;;  %v3198_v34 = vld [vmem:[#allocation2 + $0x27] sm:$0xff] }
  0xa0   : > { %v1154_v59 = vld [vmem:[#allocation2 + $0x129] sm:$0xff]  ;;  %v918_v6 = vadd.f32 %v886_v55, %v817_v54  ;;  %v1090_v2 = vmul.f32 %v3159_v5, %v1054_v56  ;;  %v1155_v3 = vld [vmem:[#allocation2 + $0x131] sm:$0xff]  ;;  %v568_v44 = vsel %vm565_vm2, %v2994_v10, %v474_v63  ;;  %v788_v46 = vmul.f32 %v3124_v42, %v1054_v56  ;;  %602 = vst.msk [vmem:[#allocation2 + $0x50] sm:$0xff] %vm331_vm0, %v569_v36 }
  0xa1   : > { %v1190_v33 = vmul.f32 %v3166_v37, %v1154_v59  ;;  %v3200_v43 = vld [vmem:[#allocation2 + $0x2f] sm:$0xff]  ;;  %601 = vst.msk [vmem:[#allocation2 + $0x48] sm:$0xff] %vm331_vm0, %v568_v44  ;;  %v919_v47 = vadd.f32 %v887_v57, %v818_v1  ;;  %v972_v9 = vmul.f32 %v3154_v4, %v3198_v34  ;;  %v1191_v7 = vmul.f32 %v3166_v37, %v1155_v3  ;;  %v3226_v1 = vld [vmem:[%s4226_s1 + $0x9] ss:$0 sm:$0xff] }
  0xa2   : > { %v3202_v45 = vld [vmem:[#allocation2 + $0x28] sm:$0xff]  ;;  %v1020_v48 = vadd.f32 %v988_v49, %v918_v6  ;;  %v973_v10 = vmul.f32 %v3154_v4, %v3200_v43  ;;  %v3211_v51 = vld [vmem:[#allocation2 + $0x30] sm:$0xff]  ;;  %v888_v8 = vmul.f32 %v3139_v53, %v1154_v59  ;;  %v512_v56 = vpop.permute.xlu1 %511  ;;  %v510_v57 = vpop.permute.xlu0 %509 }
  0xa3   : > { %v3213_v52 = vld [vmem:[#allocation2 + $0x29] sm:$0xff]  ;;  %v3215_v54 = vld [vmem:[#allocation2 + $0x31] sm:$0xff]  ;;  %v1073_v55 = vmul.f32 %v3159_v5, %v3202_v45  ;;  %v1074_v49 = vmul.f32 %v3159_v5, %v3211_v51  ;;  %v1021_v62 = vadd.f32 %v989_v58, %v919_v47  ;;  %v1004_v6 = vadd.f32 %v972_v9, %v902_v39 }
  0xa4   : > { %v1121_v63 = vadd.f32 %v1089_v50, %v1020_v48  ;;  %v1005_v36 = vadd.f32 %v973_v10, %v903_v40  ;;  %v587_v44 = vsel %vm565_vm2, %v3001_v11, %v512_v56  ;;  %v586_v0 = vsel %vm565_vm2, %v3004_v12, %v510_v57  ;;  %v3232_v61 = vld [vmem:[#allocation2 + $0x147] sm:$0xff]  ;;  %v3234_v59 = vld [vmem:[#allocation2 + $0x14f] sm:$0xff] }
  0xa5   : > { %v3236_v32 = vld [vmem:[#allocation2 + $0x148] sm:$0xff]  ;;  %v1174_v50 = vmul.f32 %v3166_v37, %v3213_v52  ;;  %v1175_v58 = vmul.f32 %v3166_v37, %v3215_v54  ;;  %620 = vst.msk [vmem:[#allocation2 + $0x170] sm:$0xff] %vm331_vm0, %v587_v44  ;;  %619 = vst.msk [vmem:[#allocation2 + $0x168] sm:$0xff] %vm331_vm0, %v586_v0  ;;  %v1122_v11 = vadd.f32 %v1090_v2, %v1021_v62  ;;  %v3246_v40 = vld [vmem:[#allocation2 + $0x150] sm:$0xff] }
  0xa6   : > { %v1222_v39 = vadd.f32 %v1190_v33, %v1121_v63  ;;  %v1293_v12 = vmul.f32 %v3171_v38, %v3232_v61  ;;  %v3248_v47 = vld [vmem:[#allocation2 + $0x149] sm:$0xff]  ;;  %v3250_v48 = vld [vmem:[#allocation2 + $0x151] sm:$0xff]  ;;  %v820_v9 = vadd.f32 %v788_v46, %v687_v35  ;;  %v1294_v10 = vmul.f32 %v3171_v38, %v3234_v59  ;;  %v480_v33 = vpop.permute.xlu1 %479  ;;  %v478_v57 = vpop.permute.xlu0 %477 }
  0xa7   : > { %v1394_v56 = vmul.f32 %v3226_v1, %v3236_v32  ;;  %v1395_v0 = vmul.f32 %v3226_v1, %v3246_v40  ;;  %v889_v2 = vmul.f32 %v3139_v53, %v1155_v3  ;;  %v1223_v62 = vadd.f32 %v1191_v7, %v1122_v11  ;;  %v3262_v44 = vld [vmem:[%s4226_s1 + $0xa] ss:$0 sm:$0xff] }
  0xa8   : > { %v1325_v63 = vadd.f32 %v1293_v12, %v1222_v39  ;;  %v1105_v35 = vadd.f32 %v1073_v55, %v1004_v6  ;;  %v1106_v46 = vadd.f32 %v1074_v49, %v1005_v36  ;;  %v571_v31 = vsel %vm565_vm2, %v3011_v13, %v480_v33  ;;  %v3272_v11 = vld [vmem:[#allocation2 + $0x47] sm:$0xff]  ;;  %v3274_v39 = vld [vmem:[#allocation2 + $0x4f] sm:$0xff]  ;;  %v3286_v36 = vld [vmem:[%s4227_s2] ss:$0 sm:$0xff] }
  0xa9   : > { %v570_v30 = vsel %vm565_vm2, %v3014_v14, %v478_v57  ;;  %v1495_v3 = vmul.f32 %v3262_v44, %v3248_v47  ;;  %v1496_v7 = vmul.f32 %v3262_v44, %v3250_v48  ;;  %v3276_v12 = vld [vmem:[#allocation2 + $0x48] sm:$0xff]  ;;  %604 = vst.msk [vmem:[#allocation2 + $0x70] sm:$0xff] %vm331_vm0, %v571_v31  ;;  %v1326_v13 = vadd.f32 %v1294_v10, %v1223_v62  ;;  %v3280_v49 = vld [vmem:[#allocation2 + $0x50] sm:$0xff] }
  0xaa   : > { %603 = vst.msk [vmem:[#allocation2 + $0x68] sm:$0xff] %vm331_vm0, %v570_v30  ;;  %v1426_v55 = vadd.f32 %v1394_v56, %v1325_v63  ;;  %v920_v14 = vadd.f32 %v888_v8, %v3186_v60  ;;  %v921_v6 = vadd.f32 %v889_v2, %v820_v9  ;;  %v1206_v33 = vadd.f32 %v1174_v50, %v1105_v35  ;;  %v516_v31 = vpop.permute.xlu1 %515  ;;  %v514_v10 = vpop.permute.xlu0 %513  ;;  %v3296_v9 = vld [vmem:[#allocation2 + $0x49] sm:$0xff]  ;;  %v3298_v50 = vld [vmem:[#allocation2 + $0x51] sm:$0xff] }
  0xab   : > { %v1207_v57 = vadd.f32 %v1175_v58, %v1106_v46  ;;  %v1277_v29 = vmul.f32 %v3171_v38, %v3272_v11  ;;  %v1278_v30 = vmul.f32 %v3171_v38, %v3274_v39  ;;  %v1427_v56 = vadd.f32 %v1395_v0, %v1326_v13 }
  0xac   : > { %v1527_v62 = vadd.f32 %v1495_v3, %v1426_v55  ;;  %v1378_v60 = vmul.f32 %v3226_v1, %v3276_v12  ;;  %v1379_v8 = vmul.f32 %v3226_v1, %v3280_v49  ;;  %v589_v58 = vsel %vm565_vm2, %v3021_v15, %v516_v31 }
  0xad   : > { %v588_v2 = vsel %vm565_vm2, %v3024_v16, %v514_v10  ;;  %v1309_v63 = vadd.f32 %v1277_v29, %v1206_v33  ;;  %v1310_v35 = vadd.f32 %v1278_v30, %v1207_v57  ;;  %622 = vst.msk [vmem:[#allocation2 + $0x190] sm:$0xff] %vm331_vm0, %v589_v58  ;;  %v1528_v0 = vadd.f32 %v1496_v7, %v1427_v56  ;;  %v3322_v58 = vld [vmem:[#allocation2 + $0x167] sm:$0xff] }
  0xae   : > { %621 = vst.msk [vmem:[#allocation2 + $0x188] sm:$0xff] %vm331_vm0, %v588_v2  ;;  %v1566_v46 = vadd.f32 %v3286_v36, %v1527_v62  ;;  %v990_v3 = vmul.f32 %v3154_v4, %v3232_v61  ;;  %v991_v13 = vmul.f32 %v3154_v4, %v3234_v59  ;;  %v1479_v16 = vmul.f32 %v3262_v44, %v3296_v9  ;;  %v484_v33 = vpop.permute.xlu1 %483  ;;  %v482_v57 = vpop.permute.xlu0 %481 }
  0xaf   : > { %v1410_v55 = vadd.f32 %v1378_v60, %v1309_v63  ;;  %v1411_v15 = vadd.f32 %v1379_v8, %v1310_v35  ;;  %v1480_v29 = vmul.f32 %v3262_v44, %v3298_v50  ;;  %v1567_v7 = vadd.f32 %v3286_v36, %v1528_v0 }
  0xb0   : > { %v1630_v30 = vmul.f32 0.70710677, %v1566_v46  ;;  %v1022_v31 = vadd.f32 %v990_v3, %v920_v14  ;;  %v1091_v10 = vmul.f32 %v3159_v5, %v3236_v32  ;;  %v573_v56 = vsel %vm565_vm2, %v3031_v17, %v484_v33  ;;  %v3336_v3 = vld [vmem:[#allocation2 + $0x16f] sm:$0xff] }
  0xb1   : > { %v572_v62 = vsel %vm565_vm2, %v3034_v18, %v482_v57  ;;  %v1511_v60 = vadd.f32 %v1479_v16, %v1410_v55  ;;  %v1512_v8 = vadd.f32 %v1480_v29, %v1411_v15  ;;  %606 = vst.msk [vmem:[#allocation2 + $0x90] sm:$0xff] %vm331_vm0, %v573_v56  ;;  %v1631_v2 = vmul.f32 0.70710677, %v1567_v7  ;;  %v3342_v29 = vld [vmem:[#allocation2 + $0x168] sm:$0xff]  ;;  %v3344_v33 = vld [vmem:[#allocation2 + $0x170] sm:$0xff] }
  0xb2   : > { %605 = vst.msk [vmem:[#allocation2 + $0x88] sm:$0xff] %vm331_vm0, %v572_v62  ;;  %2525 = verf.f32 %v1630_v30  ;;  %v1023_v14 = vadd.f32 %v991_v13, %v921_v6  ;;  %v1092_v63 = vmul.f32 %v3159_v5, %v3246_v40  ;;  %v1123_v18 = vadd.f32 %v1091_v10, %v1022_v31  ;;  %v520_v55 = vpop.permute.xlu1 %519  ;;  %v518_v15 = vpop.permute.xlu0 %517  ;;  %v3346_v57 = vld [vmem:[#allocation2 + $0x169] sm:$0xff]  ;;  %v3356_v62 = vld [vmem:[#allocation2 + $0x171] sm:$0xff] }
  0xb3   : > { %v3329_v35 = vadd.f32 %v3286_v36, %v1511_v60  ;;  %v3332_v17 = vadd.f32 %v3286_v36, %v1512_v8  ;;  %v1192_v0 = vmul.f32 %v3166_v37, %v3248_v47  ;;  %2527 = verf.f32 %v1631_v2 }
  0xb4   : > { %v1124_v16 = vadd.f32 %v1092_v63, %v1023_v14  ;;  %v1193_v6 = vmul.f32 %v3166_v37, %v3250_v48  ;;  %v1295_v13 = vmul.f32 %v3171_v38, %v3322_v58  ;;  %v591_v30 = vsel %vm565_vm2, %v3041_v19, %v520_v55 }
  0xb5   : > { %v590_v31 = vsel %vm565_vm2, %v3044_v20, %v518_v15  ;;  %v3352_v10 = vmul.f32 0.5, %v1566_v46  ;;  %v3354_v56 = vmul.f32 0.5, %v1567_v7  ;;  %624 = vst.msk [vmem:[#allocation2 + $0x1b0] sm:$0xff] %vm331_vm0, %v591_v30  ;;  %v1614_v60 = vmul.f32 0.70710677, %v3329_v35 }
  0xb6   : > { %623 = vst.msk [vmem:[#allocation2 + $0x1a8] sm:$0xff] %vm331_vm0, %v590_v31  ;;  %v1615_v8 = vmul.f32 0.70710677, %v3332_v17  ;;  %v1224_v2 = vadd.f32 %v1192_v0, %v1123_v18  ;;  %v1225_v14 = vadd.f32 %v1193_v6, %v1124_v16  ;;  %v1296_v19 = vmul.f32 %v3171_v38, %v3336_v3  ;;  %v488_v63 = vpop.permute.xlu1 %487  ;;  %v486_v55 = vpop.permute.xlu0 %485 }
  0xb7   : > { %v1396_v20 = vmul.f32 %v3226_v1, %v3342_v29  ;;  %v1397_v46 = vmul.f32 %v3226_v1, %v3344_v33  ;;  %v1497_v7 = vmul.f32 %v3262_v44, %v3346_v57  ;;  %2529 = verf.f32 %v1614_v60 }
  0xb8   : > { %v1327_v15 = vadd.f32 %v1295_v13, %v1224_v2  ;;  %v1498_v18 = vmul.f32 %v3262_v44, %v3356_v62  ;;  %v670_v0 = vmul.f32 %v3119_v41, %v3198_v34  ;;  %v575_v16 = vsel %vm565_vm2, %v3051_v21, %v488_v63 }
  0xb9   : > { %v574_v6 = vsel %vm565_vm2, %v3054_v22, %v486_v55  ;;  %2531 = verf.f32 %v1615_v8  ;;  %v1328_v30 = vadd.f32 %v1296_v19, %v1225_v14  ;;  %608 = vst.msk [vmem:[#allocation2 + $0xb0] sm:$0xff] %vm331_vm0, %v575_v16  ;;  %v671_v13 = vmul.f32 %v3119_v41, %v3200_v43 }
  0xba   : > { %607 = vst.msk [vmem:[#allocation2 + $0xa8] sm:$0xff] %vm331_vm0, %v574_v6  ;;  %v1428_v31 = vadd.f32 %v1396_v20, %v1327_v15  ;;  %v771_v60 = vmul.f32 %v3124_v42, %v3202_v45  ;;  %v772_v34 = vmul.f32 %v3124_v42, %v3211_v51  ;;  %v872_v22 = vmul.f32 %v3139_v53, %v3213_v52  ;;  %v524_v19 = vpop.permute.xlu1 %523  ;;  %v522_v20 = vpop.permute.xlu0 %521 }
  0xbb   : > { %v1429_v21 = vadd.f32 %v1397_v46, %v1328_v30  ;;  %v873_v8 = vmul.f32 %v3139_v53, %v3215_v54  ;;  %v974_v2 = vmul.f32 %v3154_v4, %v3272_v11  ;;  %v975_v45 = vmul.f32 %v3154_v4, %v3274_v39 }
  0xbc   : > { %v2526_v14 = vpop.eup %2525  ;;  %v1529_v43 = vadd.f32 %v1497_v7, %v1428_v31  ;;  %v803_v63 = vadd.f32 %v771_v60, %v670_v0  ;;  %v804_v55 = vadd.f32 %v772_v34, %v671_v13  ;;  %v593_v51 = vsel %vm565_vm2, %v3061_v23, %v524_v19  ;;  %v3416_v19 = vld [vmem:[#allocation2 + $0x67] sm:$0xff] }
  0xbd   : > { %v592_v52 = vsel %vm565_vm2, %v3064_v24, %v522_v20  ;;  %v1694_v46 = vadd.f32 1.0, %v2526_v14  ;;  %v1530_v54 = vadd.f32 %v1498_v18, %v1429_v21  ;;  %v2528_v15 = vpop.eup %2527  ;;  %626 = vst.msk [vmem:[#allocation2 + $0x1d0] sm:$0xff] %vm331_vm0, %v593_v51  ;;  %v1582_v7 = vmul.f32 0.5, %v3329_v35  ;;  %v3418_v20 = vld [vmem:[#allocation2 + $0x6f] sm:$0xff] }
  0xbe   : > { %625 = vst.msk [vmem:[#allocation2 + $0x1c8] sm:$0xff] %vm331_vm0, %v592_v52  ;;  %v1568_v0 = vadd.f32 %v3286_v36, %v1529_v43  ;;  %v904_v16 = vadd.f32 %v872_v22, %v803_v63  ;;  %v905_v6 = vadd.f32 %v873_v8, %v804_v55  ;;  %v1695_v30 = vadd.f32 1.0, %v2528_v15  ;;  %v492_v18 = vpop.permute.xlu1 %491  ;;  %v490_v13 = vpop.permute.xlu0 %489  ;;  %v3433_v52 = vld [vmem:[#allocation2 + $0x68] sm:$0xff] }
  0xbf   : > { %v1583_v31 = vmul.f32 0.5, %v3332_v17  ;;  %v3404_v23 = vadd.f32 %v3286_v36, %v1530_v54  ;;  %v1075_v24 = vmul.f32 %v3159_v5, %v3276_v12  ;;  %v1076_v35 = vmul.f32 %v3159_v5, %v3280_v49 }
  0xc0   : > { %v1632_v60 = vmul.f32 0.70710677, %v1568_v0  ;;  %v1006_v34 = vadd.f32 %v974_v2, %v904_v16  ;;  %v1007_v21 = vadd.f32 %v975_v45, %v905_v6  ;;  %v577_v22 = vsel %vm565_vm2, %v3071_v25, %v492_v18  ;;  %v1745_v25 = vld [vmem:[%s4228_s3 + $0x18] sm:$0xff] }
  0xc1   : > { %v576_v17 = vsel %vm565_vm2, %v3074_v26, %v490_v13  ;;  %v1726_v8 = vmul.f32 %v1694_v46, %v3352_v10  ;;  %v1727_v14 = vmul.f32 %v1695_v30, %v3354_v56  ;;  %v2530_v43 = vpop.eup %2529  ;;  %610 = vst.msk [vmem:[#allocation2 + $0xd0] sm:$0xff] %vm331_vm0, %v577_v22  ;;  %v1633_v26 = vmul.f32 0.70710677, %v3404_v23  ;;  %v3439_v30 = vld [vmem:[#allocation2 + $0x70] sm:$0xff] }
  0xc2   : > { %609 = vst.msk [vmem:[#allocation2 + $0xc8] sm:$0xff] %vm331_vm0, %v576_v17  ;;  %2533 = verf.f32 %v1632_v60  ;;  %v1107_v10 = vadd.f32 %v1075_v24, %v1006_v34  ;;  %v1108_v56 = vadd.f32 %v1076_v35, %v1007_v21  ;;  %v1678_v55 = vadd.f32 1.0, %v2530_v43  ;;  %v528_v46 = vpop.permute.xlu1 %527  ;;  %v526_v54 = vpop.permute.xlu0 %525  ;;  %v3441_v24 = vld [vmem:[#allocation2 + $0x69] sm:$0xff] }
  0xc3   : > { %v2532_v2 = vpop.eup %2531  ;;  %v2424_v63 = vpack.c.bf16 %v1727_v14, %v1726_v8  ;;  %v1176_v45 = vmul.f32 %v3166_v37, %v3296_v9  ;;  %v1177_v51 = vmul.f32 %v3166_v37, %v3298_v50  ;;  %2535 = verf.f32 %v1633_v26 }
  0xc4   : > { %v1679_v15 = vadd.f32 1.0, %v2532_v2  ;;  %v1279_v16 = vmul.f32 %v3171_v38, %v3416_v19  ;;  %v1280_v6 = vmul.f32 %v3171_v38, %v3418_v20  ;;  %v595_v18 = vsel %vm565_vm2, %v3081_v27, %v528_v46  ;;  %v4251_v2 = vld [vmem:[#allocation6_spill] sm:$0xff] }
  0xc5   : > { %v594_v13 = vsel %vm565_vm2, %v3084_v28, %v526_v54  ;;  %2426 = vmatprep.subr.msk.bf16.mxu0 %vm3424_vm3, %v2424_v63  ;;  %v1710_v60 = vmul.f32 %v1678_v55, %v1582_v7  ;;  %v1208_v34 = vadd.f32 %v1176_v45, %v1107_v10  ;;  %628 = vst.msk [vmem:[#allocation2 + $0x1f0] sm:$0xff] %vm331_vm0, %v595_v18  ;;  %v1600_v35 = vmul.f32 0.5, %v1568_v0  ;;  %v3455_v28 = vld [vmem:[#allocation2 + $0x71] sm:$0xff] }
  0xc6   : > { %627 = vst.msk [vmem:[#allocation2 + $0x1e8] sm:$0xff] %vm331_vm0, %v594_v13  ;;  %v1711_v21 = vmul.f32 %v1679_v15, %v1583_v31  ;;  %v1209_v22 = vadd.f32 %v1177_v51, %v1108_v56  ;;  %v1380_v17 = vmul.f32 %v3226_v1, %v3433_v52  ;;  %v1381_v27 = vmul.f32 %v3226_v1, %v3439_v30  ;;  %v496_v26 = vpop.permute.xlu1 %495  ;;  %v494_v31 = vpop.permute.xlu0 %493  ;;  %v4252_v55 = vld [vmem:[#allocation7_spill] sm:$0xff] }
  0xc7   : > { %v1311_v8 = vadd.f32 %v1279_v16, %v1208_v34  ;;  %v1481_v7 = vmul.f32 %v3262_v44, %v3441_v24  ;;  %v688_v14 = vmul.f32 %v3119_v41, %v3232_v61  ;;  %v689_v10 = vmul.f32 %v3119_v41, %v3234_v59 }
  0xc8   : > { %v2427_v43 = vpack.c.bf16 %v1711_v21, %v1710_v60  ;;  %v1312_v0 = vadd.f32 %v1280_v6, %v1209_v22  ;;  %v789_v56 = vmul.f32 %v3124_v42, %v3236_v32  ;;  %v579_v63 = vsel %vm565_vm2, %v4251_v2, %v496_v26 }
  0xc9   : > { %v578_v45 = vsel %vm565_vm2, %v4252_v55, %v494_v31  ;;  %v1412_v51 = vadd.f32 %v1380_v17, %v1311_v8  ;;  %v790_v61 = vmul.f32 %v3124_v42, %v3246_v40  ;;  %612 = vst.msk [vmem:[#allocation2 + $0xf0] sm:$0xff] %vm331_vm0, %v579_v63  ;;  %v1482_v32 = vmul.f32 %v3262_v44, %v3455_v28 }
  0xca   : > { %2429 = vmatpush3.bf16.xpose.msk.msra.mxu0 %vm3424_vm3, %v2427_v43  ;;  %611 = vst.msk [vmem:[#allocation2 + $0xe8] sm:$0xff] %vm331_vm0, %v578_v45  ;;  %v1413_v59 = vadd.f32 %v1381_v27, %v1312_v0  ;;  %v821_v46 = vadd.f32 %v789_v56, %v688_v14  ;;  %v890_v54 = vmul.f32 %v3139_v53, %v3248_v47  ;;  %v1601_v15 = vmul.f32 0.5, %v3404_v23  ;;  %v532_v13 = vpop.permute.xlu1 %531  ;;  %v530_v60 = vpop.permute.xlu0 %529  ;;  %v4253_v47 = vld [vmem:[#allocation8_spill] sm:$0xff]  ;;  %v4254_v27 = vld [vmem:[#allocation9_spill] sm:$0xff] }
  0xcb   : > { %v1513_v16 = vadd.f32 %v1481_v7, %v1412_v51  ;;  %v822_v6 = vadd.f32 %v790_v61, %v689_v10  ;;  %v992_v40 = vmul.f32 %v3154_v4, %v3322_v58  ;;  %v891_v21 = vmul.f32 %v3139_v53, %v3250_v48  ;;  %v3496_v10 = vld [vmem:[#allocation2 + $0x187] sm:$0xff]  ;;  %v3500_v45 = vld [vmem:[#allocation2 + $0x18f] sm:$0xff] }
  0xcc   : > { %v2534_v18 = vpop.eup %2533  ;;  %v1514_v34 = vadd.f32 %v1482_v32, %v1413_v59  ;;  %v922_v22 = vadd.f32 %v890_v54, %v821_v46  ;;  %v993_v17 = vmul.f32 %v3154_v4, %v3336_v3  ;;  %v597_v23 = vsel %vm565_vm2, %v4253_v47, %v532_v13  ;;  %v3504_v46 = vld [vmem:[#allocation2 + $0x188] sm:$0xff] }
  0xcd   : > { %v1696_v8 = vadd.f32 1.0, %v2534_v18  ;;  %v596_v7 = vsel %vm565_vm2, %v4254_v27, %v530_v60  ;;  %v1552_v14 = vadd.f32 %v3286_v36, %v1513_v16  ;;  %v2536_v43 = vpop.eup %2535  ;;  %630 = vst.msk [vmem:[#allocation2 + $0x210] sm:$0xff] %vm331_vm0, %v597_v23  ;;  %v923_v26 = vadd.f32 %v891_v21, %v822_v6  ;;  %v3510_v6 = vld [vmem:[#allocation2 + $0x190] sm:$0xff] }
  0xce   : > { %629 = vst.msk [vmem:[#allocation2 + $0x208] sm:$0xff] %vm331_vm0, %v596_v7  ;;  %v1553_v48 = vadd.f32 %v3286_v36, %v1514_v34  ;;  %v1024_v31 = vadd.f32 %v992_v40, %v922_v22  ;;  %v1093_v0 = vmul.f32 %v3159_v5, %v3342_v29  ;;  %v1697_v56 = vadd.f32 1.0, %v2536_v43  ;;  %v3514_v60 = vld [vmem:[#allocation2 + $0x189] sm:$0xff]  ;;  %v3524_v27 = vld [vmem:[#allocation2 + $0x191] sm:$0xff] }
  0xcf   : > { %v1728_v2 = vmul.f32 %v1696_v8, %v1600_v35  ;;  %v1616_v63 = vmul.f32 0.70710677, %v1552_v14  ;;  %v1094_v55 = vmul.f32 %v3159_v5, %v3344_v33  ;;  %v1025_v61 = vadd.f32 %v993_v17, %v923_v26 }
  0xd0   : > { %v1617_v51 = vmul.f32 0.70710677, %v1553_v48  ;;  %v1125_v59 = vadd.f32 %v1093_v0, %v1024_v31  ;;  %v1194_v32 = vmul.f32 %v3166_v37, %v3346_v57  ;;  %v1729_v54 = vmul.f32 %v1697_v56, %v1601_v15 }
  0xd1   : > { %2537 = verf.f32 %v1616_v63  ;;  %v1195_v16 = vmul.f32 %v3166_v37, %v3356_v62  ;;  %v1297_v35 = vmul.f32 %v3171_v38, %v3496_v10  ;;  %v1126_v40 = vadd.f32 %v1094_v55, %v1025_v61  ;;  %v3548_v61 = vld [vmem:[#allocation2 + $0x8f] sm:$0xff] }
  0xd2   : > { %2539 = verf.f32 %v1617_v51  ;;  %v1226_v18 = vadd.f32 %v1194_v32, %v1125_v59  ;;  %v1298_v13 = vmul.f32 %v3171_v38, %v3500_v45  ;;  %v2430_v34 = vpack.c.bf16 %v1729_v54, %v1728_v2 }
  0xd3   : > { %v1584_v21 = vmul.f32 0.5, %v1552_v14  ;;  %v1585_v15 = vmul.f32 0.5, %v1553_v48  ;;  %v1398_v22 = vmul.f32 %v3226_v1, %v3504_v46  ;;  %v1227_v17 = vadd.f32 %v1195_v16, %v1126_v40 }
  0xd4   : > { %v1329_v8 = vadd.f32 %v1297_v35, %v1226_v18  ;;  %v1399_v47 = vmul.f32 %v3226_v1, %v3510_v6  ;;  %v672_v23 = vmul.f32 %v3119_v41, %v3272_v11  ;;  %2432 = vmatprep.subr.msk.bf16.mxu0 %vm3424_vm3, %v2430_v34  ;;  %v1499_v7 = vmul.f32 %v3262_v44, %v3514_v60  ;;  %v3556_v35 = vld [vmem:[#allocation2 + $0x90] sm:$0xff] }
  0xd5   : > { %v673_v14 = vmul.f32 %v3119_v41, %v3274_v39  ;;  %v773_v43 = vmul.f32 %v3124_v42, %v3276_v12  ;;  %v774_v48 = vmul.f32 %v3124_v42, %v3280_v49  ;;  %v1330_v26 = vadd.f32 %v1298_v13, %v1227_v17  ;;  %v3542_v12 = vld [vmem:[#allocation2 + $0x87] sm:$0xff] }
  0xd6   : > { %v1430_v31 = vadd.f32 %v1398_v22, %v1329_v8  ;;  %v874_v11 = vmul.f32 %v3139_v53, %v3296_v9  ;;  %v875_v0 = vmul.f32 %v3139_v53, %v3298_v50  ;;  %v976_v63 = vmul.f32 %v3154_v4, %v3416_v19  ;;  %v3550_v50 = vld [vmem:[#allocation2 + $0x88] sm:$0xff] }
  0xd7   : > { %v805_v56 = vadd.f32 %v773_v43, %v672_v23  ;;  %v806_v2 = vadd.f32 %v774_v48, %v673_v14  ;;  %v977_v39 = vmul.f32 %v3154_v4, %v3418_v20  ;;  %v1431_v55 = vadd.f32 %v1399_v47, %v1330_v26  ;;  %v3563_v22 = vld [vmem:[#allocation2 + $0x89] sm:$0xff] }
  0xd8   : > { %v1500_v49 = vmul.f32 %v3262_v44, %v3524_v27  ;;  %v1531_v51 = vadd.f32 %v1499_v7, %v1430_v31  ;;  %v1077_v9 = vmul.f32 %v3159_v5, %v3433_v52  ;;  %v1078_v54 = vmul.f32 %v3159_v5, %v3439_v30 }
  0xd9   : > { %v906_v59 = vadd.f32 %v874_v11, %v805_v56  ;;  %v907_v32 = vadd.f32 %v875_v0, %v806_v2  ;;  %v1178_v16 = vmul.f32 %v3166_v37, %v3441_v24  ;;  %v1179_v13 = vmul.f32 %v3166_v37, %v3455_v28 }
  0xda   : > { %v1532_v40 = vadd.f32 %v1500_v49, %v1431_v55  ;;  %v1570_v18 = vadd.f32 %v3286_v36, %v1531_v51  ;;  %v1281_v34 = vmul.f32 %v3171_v38, %v3542_v12  ;;  %v1282_v23 = vmul.f32 %v3171_v38, %v3548_v61 }
  0xdb   : > { %v2538_v17 = vpop.eup %2537  ;;  %v1008_v8 = vadd.f32 %v976_v63, %v906_v59  ;;  %v1009_v47 = vadd.f32 %v977_v39, %v907_v32  ;;  %v1382_v7 = vmul.f32 %v3226_v1, %v3550_v50  ;;  %v1383_v31 = vmul.f32 %v3226_v1, %v3556_v35 }
  0xdc   : > { %v2540_v14 = vpop.eup %2539  ;;  %v1680_v43 = vadd.f32 1.0, %v2538_v17  ;;  %v1571_v48 = vadd.f32 %v3286_v36, %v1532_v40  ;;  %v1634_v26 = vmul.f32 0.70710677, %v1570_v18  ;;  %v1483_v2 = vmul.f32 %v3262_v44, %v3563_v22  ;;  %v3576_v40 = vld [vmem:[#allocation2 + $0x91] sm:$0xff] }
  0xdd   : > { %v1681_v11 = vadd.f32 1.0, %v2540_v14  ;;  %v1109_v0 = vadd.f32 %v1077_v9, %v1008_v8  ;;  %v1110_v56 = vadd.f32 %v1078_v54, %v1009_v47  ;;  %v1602_v39 = vmul.f32 0.5, %v1570_v18 }
  0xde   : > { %v1712_v63 = vmul.f32 %v1680_v43, %v1584_v21  ;;  %v1635_v55 = vmul.f32 0.70710677, %v1571_v48  ;;  %2541 = verf.f32 %v1634_v26  ;;  %v690_v32 = vmul.f32 %v3119_v41, %v3322_v58  ;;  %v3600_v26 = vld [vmem:[#allocation2 + $0x1af] sm:$0xff] }
  0xdf   : > { %v1713_v49 = vmul.f32 %v1681_v11, %v1585_v15  ;;  %v1210_v51 = vadd.f32 %v1178_v16, %v1109_v0  ;;  %v1211_v59 = vadd.f32 %v1179_v13, %v1110_v56  ;;  %v691_v9 = vmul.f32 %v3119_v41, %v3336_v3  ;;  %v3602_v11 = vld [vmem:[#allocation2 + $0x1a8] sm:$0xff] }
  0xe0   : > { %2543 = verf.f32 %v1635_v55  ;;  %v791_v54 = vmul.f32 %v3124_v42, %v3342_v29  ;;  %v792_v21 = vmul.f32 %v3124_v42, %v3344_v33  ;;  %v892_v16 = vmul.f32 %v3139_v53, %v3346_v57  ;;  %v3596_v57 = vld [vmem:[#allocation2 + $0x1a7] sm:$0xff] }
  0xe1   : > { %v2433_v18 = vpack.c.bf16 %v1713_v49, %v1712_v63  ;;  %v1313_v17 = vadd.f32 %v1281_v34, %v1210_v51  ;;  %v1314_v15 = vadd.f32 %v1282_v23, %v1211_v59  ;;  %v893_v8 = vmul.f32 %v3139_v53, %v3356_v62  ;;  %v3608_v63 = vld [vmem:[#allocation2 + $0x1b0] sm:$0xff] }
  0xe2   : > { %v823_v13 = vadd.f32 %v791_v54, %v690_v32  ;;  %v824_v58 = vadd.f32 %v792_v21, %v691_v9  ;;  %v994_v3 = vmul.f32 %v3154_v4, %v3496_v10  ;;  %v1484_v33 = vmul.f32 %v3262_v44, %v3576_v40 }
  0xe3   : > { %2435 = vmatpush3.bf16.xpose.msk.msra.mxu0 %vm3424_vm3, %v2433_v18  ;;  %v1414_v29 = vadd.f32 %v1382_v7, %v1313_v17  ;;  %v1415_v47 = vadd.f32 %v1383_v31, %v1314_v15  ;;  %v995_v34 = vmul.f32 %v3154_v4, %v3500_v45  ;;  %v1603_v23 = vmul.f32 0.5, %v1571_v48  ;;  %v3610_v48 = vld [vmem:[#allocation2 + $0x1a9] sm:$0xff] }
  0xe4   : > { %v924_v14 = vadd.f32 %v892_v16, %v823_v13  ;;  %v925_v43 = vadd.f32 %v893_v8, %v824_v58  ;;  %v1095_v62 = vmul.f32 %v3159_v5, %v3504_v46  ;;  %v1096_v0 = vmul.f32 %v3159_v5, %v3510_v6 }
  0xe5   : > { %v1515_v7 = vadd.f32 %v1483_v2, %v1414_v29  ;;  %v1516_v31 = vadd.f32 %v1484_v33, %v1415_v47  ;;  %v1196_v56 = vmul.f32 %v3166_v37, %v3514_v60  ;;  %v1197_v51 = vmul.f32 %v3166_v37, %v3524_v27  ;;  %v3616_v2 = vld [vmem:[#allocation2 + $0x1b1] sm:$0xff] }
  0xe6   : > { %v1026_v55 = vadd.f32 %v994_v3, %v924_v14  ;;  %v1027_v49 = vadd.f32 %v995_v34, %v925_v43  ;;  %v1299_v59 = vmul.f32 %v3171_v38, %v3596_v57  ;;  %v1300_v54 = vmul.f32 %v3171_v38, %v3600_v26 }
  0xe7   : > { %v1554_v32 = vadd.f32 %v3286_v36, %v1515_v7  ;;  %v1555_v9 = vadd.f32 %v3286_v36, %v1516_v31  ;;  %v1400_v21 = vmul.f32 %v3226_v1, %v3602_v11  ;;  %v1401_v16 = vmul.f32 %v3226_v1, %v3608_v63 }
  0xe8   : > { %v2542_v18 = vpop.eup %2541  ;;  %v1127_v17 = vadd.f32 %v1095_v62, %v1026_v55  ;;  %v1128_v15 = vadd.f32 %v1096_v0, %v1027_v49  ;;  %v1501_v13 = vmul.f32 %v3262_v44, %v3610_v48  ;;  %v1502_v3 = vmul.f32 %v3262_v44, %v3616_v2 }
  0xe9   : > { %v1698_v58 = vadd.f32 1.0, %v2542_v18  ;;  %v1618_v8 = vmul.f32 0.70710677, %v1554_v32  ;;  %v674_v29 = vmul.f32 %v3119_v41, %v3416_v19  ;;  %v1619_v33 = vmul.f32 0.70710677, %v1555_v9 }
  0xea   : > { %v2544_v47 = vpop.eup %2543  ;;  %v1228_v34 = vadd.f32 %v1196_v56, %v1127_v17  ;;  %v1229_v14 = vadd.f32 %v1197_v51, %v1128_v15  ;;  %v675_v43 = vmul.f32 %v3119_v41, %v3418_v20  ;;  %v775_v31 = vmul.f32 %v3124_v42, %v3433_v52 }
  0xeb   : > { %v1699_v62 = vadd.f32 1.0, %v2544_v47  ;;  %v1730_v7 = vmul.f32 %v1698_v58, %v1602_v39  ;;  %2545 = verf.f32 %v1618_v8  ;;  %v776_v49 = vmul.f32 %v3124_v42, %v3439_v30  ;;  %v3648_v8 = vld [vmem:[#allocation2 + $0xaf] sm:$0xff] }
  0xec   : > { %2547 = verf.f32 %v1619_v33  ;;  %v1331_v0 = vadd.f32 %v1299_v59, %v1228_v34  ;;  %v1332_v55 = vadd.f32 %v1300_v54, %v1229_v14  ;;  %v807_v18 = vadd.f32 %v775_v31, %v674_v29  ;;  %v1742_v33 = vld [vmem:[%s4228_s3] sm:$0xff] }
  0xed   : > { %v1731_v19 = vmul.f32 %v1699_v62, %v1603_v23  ;;  %v876_v56 = vmul.f32 %v3139_v53, %v3441_v24  ;;  %v877_v41 = vmul.f32 %v3139_v53, %v3455_v28  ;;  %v808_v51 = vadd.f32 %v776_v49, %v675_v43  ;;  %v3646_v24 = vld [vmem:[#allocation2 + $0xa7] sm:$0xff]  ;;  %2416 = vmatprep.mubr.msk.f32.mxu0 %vm331_vm0, %v1742_v33 }
  0xee   : > { %v1432_v20 = vadd.f32 %v1400_v21, %v1331_v0  ;;  %v1433_v39 = vadd.f32 %v1401_v16, %v1332_v55  ;;  %v978_v52 = vmul.f32 %v3154_v4, %v3542_v12  ;;  %v1586_v59 = vmul.f32 0.5, %v1554_v32  ;;  %v3650_v53 = vld [vmem:[#allocation2 + $0xa8] sm:$0xff]  ;;  %v3660_v21 = vld [vmem:[#allocation2 + $0xb0] sm:$0xff] }
  0xef   : > { %v2436_v17 = vpack.c.bf16 %v1731_v19, %v1730_v7  ;;  %v908_v54 = vadd.f32 %v876_v56, %v807_v18  ;;  %v979_v42 = vmul.f32 %v3154_v4, %v3548_v61  ;;  %v1587_v30 = vmul.f32 0.5, %v1555_v9  ;;  %v3662_v16 = vld [vmem:[#allocation2 + $0xa9] sm:$0xff] }
  0xf0   : > { %v1533_v23 = vadd.f32 %v1501_v13, %v1432_v20  ;;  %v1534_v15 = vadd.f32 %v1502_v3, %v1433_v39  ;;  %v909_v58 = vadd.f32 %v877_v41, %v808_v51  ;;  %v1079_v32 = vmul.f32 %v3159_v5, %v3550_v50  ;;  %v3696_v39 = vld [vmem:[%s4226_s1 + $0x1] ss:$0 sm:$0xff] }
  0xf1   : > { %2438 = vmatprep.subr.msk.bf16.mxu0 %vm3424_vm3, %v2436_v17  ;;  %v1010_v28 = vadd.f32 %v978_v52, %v908_v54  ;;  %v1080_v4 = vmul.f32 %v3159_v5, %v3556_v35  ;;  %v1180_v9 = vmul.f32 %v3166_v37, %v3563_v22  ;;  %v1181_v47 = vmul.f32 %v3166_v37, %v3576_v40 }
  0xf2   : > { %v1572_v13 = vadd.f32 %v3286_v36, %v1533_v23  ;;  %v1573_v3 = vadd.f32 %v3286_v36, %v1534_v15  ;;  %v1011_v29 = vadd.f32 %v979_v42, %v909_v58  ;;  %v1283_v34 = vmul.f32 %v3171_v38, %v3646_v24 }
  0xf3   : > { %v1111_v5 = vadd.f32 %v1079_v32, %v1010_v28  ;;  %v1284_v14 = vmul.f32 %v3171_v38, %v3648_v8  ;;  %v1384_v43 = vmul.f32 %v3226_v1, %v3650_v53  ;;  %v1385_v37 = vmul.f32 %v3226_v1, %v3660_v21  ;;  %v3687_v38 = vld [vmem:[%s4226_s1] ss:$0 sm:$0xff] }
  0xf4   : > { %v1636_v62 = vmul.f32 0.70710677, %v1572_v13  ;;  %v1637_v7 = vmul.f32 0.70710677, %v1573_v3  ;;  %v1485_v31 = vmul.f32 %v3262_v44, %v3662_v16  ;;  %v3682_v55 = vmul.f32 0.5, %v1572_v13 }
  0xf5   : > { %v2546_v0 = vpop.eup %2545  ;;  %v1112_v49 = vadd.f32 %v1080_v4, %v1011_v29  ;;  %v1212_v19 = vadd.f32 %v1180_v9, %v1111_v5  ;;  %v692_v18 = vmul.f32 %v3687_v38, %v3496_v10  ;;  %v693_v20 = vmul.f32 %v3687_v38, %v3500_v45  ;;  %v3700_v10 = vld [vmem:[#allocation2 + $0xb1] sm:$0xff]  ;;  %v3707_v45 = vld [vmem:[%s4226_s1 + $0x2] ss:$0 sm:$0xff] }
  0xf6   : > { %v2548_v56 = vpop.eup %2547  ;;  %v1682_v41 = vadd.f32 1.0, %v2546_v0  ;;  %2549 = verf.f32 %v1636_v62  ;;  %v793_v51 = vmul.f32 %v3696_v39, %v3504_v46  ;;  %v794_v23 = vmul.f32 %v3696_v39, %v3510_v6  ;;  %v3716_v6 = vld [vmem:[%s4226_s1 + $0x4] ss:$0 sm:$0xff] }
  0xf7   : > { %v1683_v52 = vadd.f32 1.0, %v2548_v56  ;;  %2551 = verf.f32 %v1637_v7  ;;  %v1213_v17 = vadd.f32 %v1181_v47, %v1112_v49  ;;  %v1315_v54 = vadd.f32 %v1283_v34, %v1212_v19  ;;  %v3733_v7 = vld [vmem:[#allocation2 + $0x1cf] sm:$0xff]  ;;  %v3745_v49 = vld [vmem:[%s4226_s1 + $0x6] ss:$0 sm:$0xff] }
  0xf8   : > { %v1714_v42 = vmul.f32 %v1682_v41, %v1586_v59  ;;  %v825_v15 = vadd.f32 %v793_v51, %v692_v18  ;;  %v894_v58 = vmul.f32 %v3707_v45, %v3514_v60  ;;  %v895_v59 = vmul.f32 %v3707_v45, %v3524_v27  ;;  %v3724_v27 = vld [vmem:[#allocation2 + $0x1c7] sm:$0xff]  ;;  %v3749_v18 = vld [vmem:[#allocation2 + $0x1d0] sm:$0xff] }
  0xf9   : > { %v1715_v46 = vmul.f32 %v1683_v52, %v1587_v30  ;;  %v1316_v28 = vadd.f32 %v1284_v14, %v1213_v17  ;;  %v1416_v32 = vadd.f32 %v1384_v43, %v1315_v54  ;;  %v826_v4 = vadd.f32 %v794_v23, %v693_v20  ;;  %v3729_v43 = vld [vmem:[%s4226_s1 + $0x5] ss:$0 sm:$0xff]  ;;  %v3751_v56 = vld [vmem:[#allocation2 + $0x1c9] sm:$0xff]  ;;  %v3758_v52 = vld [vmem:[%s4226_s1 + $0x8] ss:$0 sm:$0xff] }
  0xfa   : > { %v926_v9 = vadd.f32 %v894_v58, %v825_v15  ;;  %v996_v13 = vmul.f32 %v3716_v6, %v3596_v57  ;;  %v997_v29 = vmul.f32 %v3716_v6, %v3600_v26  ;;  %v1486_v47 = vmul.f32 %v3262_v44, %v3700_v10  ;;  %v3762_v54 = vld [vmem:[#allocation2 + $0x1d1] sm:$0xff] }
  0xfb   : > { %v2439_v60 = vpack.c.bf16 %v1715_v46, %v1714_v42  ;;  %v1417_v30 = vadd.f32 %v1385_v37, %v1316_v28  ;;  %v1517_v33 = vadd.f32 %v1485_v31, %v1416_v32  ;;  %v1605_v5 = vmul.f32 0.5, %v1573_v3  ;;  %v3735_v37 = vld [vmem:[#allocation2 + $0x1c8] sm:$0xff] }
  0xfc   : > { %v927_v34 = vadd.f32 %v895_v59, %v826_v4  ;;  %v1028_v14 = vadd.f32 %v996_v13, %v926_v9  ;;  %v1097_v62 = vmul.f32 %v3729_v43, %v3602_v11  ;;  %v1098_v0 = vmul.f32 %v3729_v43, %v3608_v63 }
  0xfd   : > { %2441 = vmatpush3.bf16.xpose.msk.msra.mxu0 %vm3424_vm3, %v2439_v60  ;;  %v1518_v31 = vadd.f32 %v1486_v47, %v1417_v30  ;;  %v1556_v3 = vadd.f32 %v3286_v36, %v1517_v33  ;;  %v1198_v19 = vmul.f32 %v3745_v49, %v3610_v48  ;;  %v1199_v51 = vmul.f32 %v3745_v49, %v3616_v2 }
  0xfe   : > { %v1029_v41 = vadd.f32 %v997_v29, %v927_v34  ;;  %v1129_v20 = vadd.f32 %v1097_v62, %v1028_v14  ;;  %v1301_v17 = vmul.f32 %v3758_v52, %v3724_v27  ;;  %v1302_v15 = vmul.f32 %v3758_v52, %v3733_v7 }
  0xff   : > { %v1557_v42 = vadd.f32 %v3286_v36, %v1518_v31  ;;  %v1620_v23 = vmul.f32 0.70710677, %v1556_v3  ;;  %v1402_v58 = vmul.f32 %v3226_v1, %v3735_v37  ;;  %v1403_v59 = vmul.f32 %v3226_v1, %v3749_v18 }
 0x100   : > { %v2550_v46 = vpop.eup %2549  ;;  %v1130_v28 = vadd.f32 %v1098_v0, %v1029_v41  ;;  %v1230_v32 = vadd.f32 %v1198_v19, %v1129_v20  ;;  %v1503_v4 = vmul.f32 %v3262_v44, %v3751_v56  ;;  %v1504_v60 = vmul.f32 %v3262_v44, %v3762_v54 }
 0x101   : > { %v2552_v9 = vpop.eup %2551  ;;  %v1700_v13 = vadd.f32 1.0, %v2550_v46  ;;  %v1621_v29 = vmul.f32 0.70710677, %v1557_v42  ;;  %2553 = verf.f32 %v1620_v23  ;;  %v676_v34 = vmul.f32 %v3687_v38, %v3542_v12 }
 0x102   : > { %v1701_v30 = vadd.f32 1.0, %v2552_v9  ;;  %v1231_v47 = vadd.f32 %v1199_v51, %v1130_v28  ;;  %v1333_v33 = vadd.f32 %v1301_v17, %v1230_v32  ;;  %v677_v1 = vmul.f32 %v3687_v38, %v3548_v61  ;;  %v3799_v32 = vld [vmem:[#allocation2 + $0xcf] sm:$0xff] }
 0x103   : > { %v1732_v14 = vmul.f32 %v1700_v13, %v3682_v55  ;;  %2555 = verf.f32 %v1621_v29  ;;  %v777_v62 = vmul.f32 %v3696_v39, %v3550_v50  ;;  %v778_v44 = vmul.f32 %v3696_v39, %v3556_v35  ;;  %v3809_v13 = vld [vmem:[#allocation2 + $0xd0] sm:$0xff] }
 0x104   : > { %v1733_v31 = vmul.f32 %v1701_v30, %v1605_v5  ;;  %v1334_v0 = vadd.f32 %v1302_v15, %v1231_v47  ;;  %v1434_v19 = vadd.f32 %v1402_v58, %v1333_v33  ;;  %v878_v20 = vmul.f32 %v3707_v45, %v3563_v22  ;;  %v3792_v58 = vld [vmem:[#allocation2 + $0xc7] sm:$0xff] }
 0x105   : > { %v809_v41 = vadd.f32 %v777_v62, %v676_v34  ;;  %v879_v12 = vmul.f32 %v3707_v45, %v3576_v40  ;;  %v980_v55 = vmul.f32 %v3716_v6, %v3646_v24  ;;  %v810_v50 = vadd.f32 %v778_v44, %v677_v1  ;;  %v3814_v33 = vld [vmem:[#allocation2 + $0xc9] sm:$0xff] }
 0x106   : > { %v2442_v61 = vpack.c.bf16 %v1733_v31, %v1732_v14  ;;  %v1435_v51 = vadd.f32 %v1403_v59, %v1334_v0  ;;  %v1535_v17 = vadd.f32 %v1503_v4, %v1434_v19  ;;  %v1588_v5 = vmul.f32 0.5, %v1556_v3  ;;  %v3801_v3 = vld [vmem:[#allocation2 + $0xc8] sm:$0xff] }
 0x107   : > { %v1589_v23 = vmul.f32 0.5, %v1557_v42  ;;  %v910_v15 = vadd.f32 %v878_v20, %v809_v41  ;;  %v981_v35 = vmul.f32 %v3716_v6, %v3648_v8  ;;  %v911_v46 = vadd.f32 %v879_v12, %v810_v50  ;;  %v3823_v31 = vld [vmem:[%s4226_s1 + $0x9] ss:$0 sm:$0xff] }
 0x108   : > { %2444 = vmatprep.subr.msk.bf16.mxu0 %vm3424_vm3, %v2442_v61  ;;  %v1536_v22 = vadd.f32 %v1504_v60, %v1435_v51  ;;  %v1574_v40 = vadd.f32 %v3286_v36, %v1535_v17  ;;  %v1081_v28 = vmul.f32 %v3729_v43, %v3650_v53  ;;  %v1082_v59 = vmul.f32 %v3729_v43, %v3660_v21 }
 0x109   : > { %v1012_v42 = vadd.f32 %v980_v55, %v910_v15  ;;  %v1182_v4 = vmul.f32 %v3745_v49, %v3662_v16  ;;  %v1183_v9 = vmul.f32 %v3745_v49, %v3700_v10  ;;  %v1013_v30 = vadd.f32 %v981_v35, %v911_v46  ;;  %v3832_v55 = vld [vmem:[%s4226_s1 + $0xa] ss:$0 sm:$0xff] }
 0x10a   : > { %v1575_v29 = vadd.f32 %v3286_v36, %v1536_v22  ;;  %v1638_v60 = vmul.f32 0.70710677, %v1574_v40  ;;  %v1285_v47 = vmul.f32 %v3758_v52, %v3792_v58  ;;  %v3816_v14 = vmul.f32 0.5, %v1574_v40  ;;  %v3840_v40 = vld [vmem:[#allocation2 + $0xd1] sm:$0xff] }
 0x10b   : > { %v2554_v34 = vpop.eup %2553  ;;  %v1113_v1 = vadd.f32 %v1081_v28, %v1012_v42  ;;  %v1286_v62 = vmul.f32 %v3758_v52, %v3799_v32  ;;  %v1386_v36 = vmul.f32 %v3823_v31, %v3801_v3  ;;  %v1387_v44 = vmul.f32 %v3823_v31, %v3809_v13 }
 0x10c   : > { %v1684_v0 = vadd.f32 1.0, %v2554_v34  ;;  %v1639_v19 = vmul.f32 0.70710677, %v1575_v29  ;;  %2557 = verf.f32 %v1638_v60  ;;  %v1114_v20 = vadd.f32 %v1082_v59, %v1013_v30 }
 0x10d   : > { %v2556_v41 = vpop.eup %2555  ;;  %v1214_v12 = vadd.f32 %v1182_v4, %v1113_v1  ;;  %v1487_v61 = vmul.f32 %v3832_v55, %v3814_v33  ;;  %v694_v51 = vmul.f32 %v3687_v38, %v3596_v57  ;;  %v695_v15 = vmul.f32 %v3687_v38, %v3600_v26 }
 0x10e   : > { %v1685_v17 = vadd.f32 1.0, %v2556_v41  ;;  %v1716_v50 = vmul.f32 %v1684_v0, %v1588_v5  ;;  %2559 = verf.f32 %v1639_v19  ;;  %v1215_v35 = vadd.f32 %v1183_v9, %v1114_v20  ;;  %v3858_v0 = vld [vmem:[#allocation2 + $0x1ef] sm:$0xff] }
 0x10f   : > { %v1317_v22 = vadd.f32 %v1285_v47, %v1214_v12  ;;  %v795_v46 = vmul.f32 %v3696_v39, %v3602_v11  ;;  %v796_v28 = vmul.f32 %v3696_v39, %v3608_v63  ;;  %v896_v57 = vmul.f32 %v3707_v45, %v3610_v48  ;;  %v3874_v20 = vld [vmem:[#allocation2 + $0x1e9] sm:$0xff] }
 0x110   : > { %v1717_v42 = vmul.f32 %v1685_v17, %v1589_v23  ;;  %v897_v5 = vmul.f32 %v3707_v45, %v3616_v2  ;;  %v998_v26 = vmul.f32 %v3716_v6, %v3724_v27  ;;  %v1318_v59 = vadd.f32 %v1286_v62, %v1215_v35  ;;  %v3856_v23 = vld [vmem:[#allocation2 + $0x1e7] sm:$0xff] }
 0x111   : > { %v1418_v4 = vadd.f32 %v1386_v36, %v1317_v22  ;;  %v827_v9 = vadd.f32 %v795_v46, %v694_v51  ;;  %v828_v60 = vadd.f32 %v796_v28, %v695_v15  ;;  %v1607_v47 = vmul.f32 0.5, %v1575_v29  ;;  %v3860_v62 = vld [vmem:[#allocation2 + $0x1e8] sm:$0xff]  ;;  %v3862_v36 = vld [vmem:[#allocation2 + $0x1f0] sm:$0xff] }
 0x112   : > { %v2445_v30 = vpack.c.bf16 %v1717_v42, %v1716_v50  ;;  %v1488_v11 = vmul.f32 %v3832_v55, %v3840_v40  ;;  %v999_v63 = vmul.f32 %v3716_v6, %v3733_v7  ;;  %v1419_v48 = vadd.f32 %v1387_v44, %v1318_v59  ;;  %v3882_v15 = vld [vmem:[#allocation2 + $0x1f1] sm:$0xff] }
 0x113   : > { %v1519_v34 = vadd.f32 %v1487_v61, %v1418_v4  ;;  %v928_v2 = vadd.f32 %v896_v57, %v827_v9  ;;  %v929_v1 = vadd.f32 %v897_v5, %v828_v60  ;;  %v1099_v29 = vmul.f32 %v3729_v43, %v3735_v37  ;;  %v3879_v61 = vld [vmem:[%s4227_s2] ss:$0 sm:$0xff] }
 0x114   : > { %2447 = vmatpush3.bf16.xpose.msk.msra.mxu0 %vm3424_vm3, %v2445_v30  ;;  %v1100_v19 = vmul.f32 %v3729_v43, %v3749_v18  ;;  %v1200_v44 = vmul.f32 %v3745_v49, %v3751_v56  ;;  %v1201_v41 = vmul.f32 %v3745_v49, %v3762_v54  ;;  %v1520_v12 = vadd.f32 %v1488_v11, %v1419_v48 }
 0x115   : > { %v1558_v51 = vadd.f32 %v3879_v61, %v1519_v34  ;;  %v1030_v17 = vadd.f32 %v998_v26, %v928_v2  ;;  %v1031_v50 = vadd.f32 %v999_v63, %v929_v1  ;;  %v1303_v22 = vmul.f32 %v3758_v52, %v3856_v23 }
 0x116   : > { %v2558_v35 = vpop.eup %2557  ;;  %v1304_v46 = vmul.f32 %v3758_v52, %v3858_v0  ;;  %v1404_v28 = vmul.f32 %v3823_v31, %v3860_v62  ;;  %v1405_v42 = vmul.f32 %v3823_v31, %v3862_v36  ;;  %v1559_v5 = vadd.f32 %v3879_v61, %v1520_v12 }
 0x117   : > { %v1702_v57 = vadd.f32 1.0, %v2558_v35  ;;  %v1622_v26 = vmul.f32 0.70710677, %v1558_v51  ;;  %v1505_v59 = vmul.f32 %v3832_v55, %v3874_v20  ;;  %v1131_v9 = vadd.f32 %v1099_v29, %v1030_v17 }
 0x118   : > { %v2560_v4 = vpop.eup %2559  ;;  %v1132_v60 = vadd.f32 %v1100_v19, %v1031_v50  ;;  %v1506_v30 = vmul.f32 %v3832_v55, %v3882_v15  ;;  %v678_v11 = vmul.f32 %v3687_v38, %v3646_v24  ;;  %v1623_v34 = vmul.f32 0.70710677, %v1559_v5 }
 0x119   : > { %v1703_v63 = vadd.f32 1.0, %v2560_v4  ;;  %v1734_v48 = vmul.f32 %v1702_v57, %v3816_v14  ;;  %v679_v2 = vmul.f32 %v3687_v38, %v3648_v8  ;;  %2561 = verf.f32 %v1622_v26 }
 0x11a   : > { %v1232_v1 = vadd.f32 %v1200_v44, %v1131_v9  ;;  %v1233_v12 = vadd.f32 %v1201_v41, %v1132_v60  ;;  %v779_v29 = vmul.f32 %v3696_v39, %v3650_v53  ;;  %2563 = verf.f32 %v1623_v34  ;;  %v3914_v9 = vld [vmem:[#allocation2 + $0xe7] sm:$0xff] }
 0x11b   : > { %v1735_v19 = vmul.f32 %v1703_v63, %v1607_v47  ;;  %v780_v17 = vmul.f32 %v3696_v39, %v3660_v21  ;;  %v880_v24 = vmul.f32 %v3707_v45, %v3662_v16  ;;  %v881_v8 = vmul.f32 %v3707_v45, %v3700_v10  ;;  %v3916_v16 = vld [vmem:[#allocation2 + $0xef] sm:$0xff] }
 0x11c   : > { %v1335_v50 = vadd.f32 %v1303_v22, %v1232_v1  ;;  %v1336_v14 = vadd.f32 %v1304_v46, %v1233_v12  ;;  %v811_v35 = vadd.f32 %v779_v29, %v678_v11  ;;  %v982_v41 = vmul.f32 %v3716_v6, %v3792_v58  ;;  %v3924_v11 = vld [vmem:[#allocation2 + $0xe8] sm:$0xff] }
 0x11d   : > { %v2448_v57 = vpack.c.bf16 %v1735_v19, %v1734_v48  ;;  %v812_v44 = vadd.f32 %v780_v17, %v679_v2  ;;  %v983_v53 = vmul.f32 %v3716_v6, %v3799_v32  ;;  %v1590_v47 = vmul.f32 0.5, %v1558_v51  ;;  %v3928_v48 = vld [vmem:[#allocation2 + $0xf0] sm:$0xff] }
 0x11e   : > { %v1436_v26 = vadd.f32 %v1404_v28, %v1335_v50  ;;  %v1437_v21 = vadd.f32 %v1405_v42, %v1336_v14  ;;  %v912_v4 = vadd.f32 %v880_v24, %v811_v35  ;;  %v1591_v10 = vmul.f32 0.5, %v1559_v5  ;;  %v3930_v34 = vld [vmem:[#allocation2 + $0xe9] sm:$0xff]  ;;  %v3932_v5 = vld [vmem:[#allocation2 + $0xf1] sm:$0xff] }
 0x11f   : > { %2450 = vmatprep.subr.msk.bf16.mxu0 %vm3424_vm3, %v2448_v57  ;;  %v913_v22 = vadd.f32 %v881_v8, %v812_v44  ;;  %v1083_v46 = vmul.f32 %v3729_v43, %v3801_v3  ;;  %v1084_v60 = vmul.f32 %v3729_v43, %v3809_v13  ;;  %v1184_v63 = vmul.f32 %v3745_v49, %v3814_v33 }
 0x120   : > { %v1537_v51 = vadd.f32 %v1505_v59, %v1436_v26  ;;  %v1538_v28 = vadd.f32 %v1506_v30, %v1437_v21  ;;  %v1014_v42 = vadd.f32 %v982_v41, %v912_v4  ;;  %4255 = vst [vmem:[#allocation6_spill] sm:$0xff] %v3932_v5  ;;  %v1185_v1 = vmul.f32 %v3745_v49, %v3840_v40 }
 0x121   : > { %v1015_v2 = vadd.f32 %v983_v53, %v913_v22  ;;  %v1287_v12 = vmul.f32 %v3758_v52, %v3914_v9  ;;  %v1288_v59 = vmul.f32 %v3758_v52, %v3916_v16  ;;  %v1388_v17 = vmul.f32 %v3823_v31, %v3924_v11 }
 0x122   : > { %v1576_v30 = vadd.f32 %v3879_v61, %v1537_v51  ;;  %v1577_v29 = vadd.f32 %v3879_v61, %v1538_v28  ;;  %v1115_v19 = vadd.f32 %v1083_v46, %v1014_v42  ;;  %v1389_v50 = vmul.f32 %v3823_v31, %v3928_v48 }
 0x123   : > { %v1116_v24 = vadd.f32 %v1084_v60, %v1015_v2  ;;  %v1489_v14 = vmul.f32 %v3832_v55, %v3930_v34  ;;  %v1490_v35 = vmul.f32 %v3832_v55, %v3932_v5  ;;  %v2562_v8 = vpop.eup %2561  ;;  %v696_v41 = vmul.f32 %v3687_v38, %v3724_v27 }
 0x124   : > { %v1640_v57 = vmul.f32 0.70710677, %v1576_v30  ;;  %v1641_v44 = vmul.f32 0.70710677, %v1577_v29  ;;  %v697_v53 = vmul.f32 %v3687_v38, %v3733_v7  ;;  %v2564_v26 = vpop.eup %2563  ;;  %v1686_v21 = vadd.f32 1.0, %v2562_v8 }
 0x125   : > { %v1216_v4 = vadd.f32 %v1184_v63, %v1115_v19  ;;  %v1217_v22 = vadd.f32 %v1185_v1, %v1116_v24  ;;  %v797_v46 = vmul.f32 %v3696_v39, %v3735_v37  ;;  %v1687_v60 = vadd.f32 1.0, %v2564_v26 }
 0x126   : > { %2565 = verf.f32 %v1640_v57  ;;  %v798_v51 = vmul.f32 %v3696_v39, %v3749_v18  ;;  %v898_v28 = vmul.f32 %v3707_v45, %v3751_v56  ;;  %v1718_v42 = vmul.f32 %v1686_v21, %v1590_v47 }
 0x127   : > { %2567 = verf.f32 %v1641_v44  ;;  %v1319_v27 = vadd.f32 %v1287_v12, %v1216_v4  ;;  %v1320_v2 = vadd.f32 %v1288_v59, %v1217_v22  ;;  %v1719_v7 = vmul.f32 %v1687_v60, %v1591_v10  ;;  %v3966_v12 = vld [vmem:[#allocation2 + $0x207] sm:$0xff]  ;;  %v3990_v22 = vld [vmem:[#allocation2 + $0x211] sm:$0xff] }
 0x128   : > { %v829_v5 = vadd.f32 %v797_v46, %v696_v41  ;;  %v830_v8 = vadd.f32 %v798_v51, %v697_v53  ;;  %v899_v63 = vmul.f32 %v3707_v45, %v3762_v54  ;;  %v1000_v19 = vmul.f32 %v3716_v6, %v3856_v23 }
 0x129   : > { %v1420_v1 = vadd.f32 %v1388_v17, %v1319_v27  ;;  %v1421_v37 = vadd.f32 %v1389_v50, %v1320_v2  ;;  %v1001_v18 = vmul.f32 %v3716_v6, %v3858_v0  ;;  %v2451_v24 = vpack.c.bf16 %v1719_v7, %v1718_v42  ;;  %v3970_v17 = vld [vmem:[#allocation2 + $0x20f] sm:$0xff] }
 0x12a   : > { %v1608_v56 = vmul.f32 0.5, %v1576_v30  ;;  %v930_v47 = vadd.f32 %v898_v28, %v829_v5  ;;  %v931_v57 = vadd.f32 %v899_v63, %v830_v8  ;;  %v1609_v10 = vmul.f32 0.5, %v1577_v29  ;;  %v3972_v50 = vld [vmem:[#allocation2 + $0x208] sm:$0xff]  ;;  %v3980_v29 = vld [vmem:[#allocation2 + $0x210] sm:$0xff] }
 0x12b   : > { %v1521_v59 = vadd.f32 %v1489_v14, %v1420_v1  ;;  %v1522_v44 = vadd.f32 %v1490_v35, %v1421_v37  ;;  %v1101_v54 = vmul.f32 %v3729_v43, %v3860_v62  ;;  %2453 = vmatpush3.bf16.xpose.msk.msra.mxu0 %vm3424_vm3, %v2451_v24  ;;  %v1102_v5 = vmul.f32 %v3729_v43, %v3862_v36  ;;  %v3982_v14 = vld [vmem:[#allocation2 + $0x209] sm:$0xff] }
 0x12c   : > { %v1032_v41 = vadd.f32 %v1000_v19, %v930_v47  ;;  %v1033_v53 = vadd.f32 %v1001_v18, %v931_v57  ;;  %v1202_v30 = vmul.f32 %v3745_v49, %v3874_v20  ;;  %v1203_v21 = vmul.f32 %v3745_v49, %v3882_v15 }
 0x12d   : > { %v1560_v35 = vadd.f32 %v3879_v61, %v1521_v59  ;;  %v1561_v26 = vadd.f32 %v3879_v61, %v1522_v44  ;;  %v1305_v4 = vmul.f32 %v3758_v52, %v3966_v12  ;;  %v1306_v51 = vmul.f32 %v3758_v52, %v3970_v17 }
 0x12e   : > { %v1133_v46 = vadd.f32 %v1101_v54, %v1032_v41  ;;  %v1134_v60 = vadd.f32 %v1102_v5, %v1033_v53  ;;  %v1406_v28 = vmul.f32 %v3823_v31, %v3972_v50  ;;  %v1407_v2 = vmul.f32 %v3823_v31, %v3980_v29 }
 0x12f   : > { %v1624_v42 = vmul.f32 0.70710677, %v1560_v35  ;;  %v1625_v27 = vmul.f32 0.70710677, %v1561_v26  ;;  %v1507_v7 = vmul.f32 %v3832_v55, %v3982_v14  ;;  %v1508_v37 = vmul.f32 %v3832_v55, %v3990_v22 }
 0x130   : > { %v2566_v8 = vpop.eup %2565  ;;  %v1234_v63 = vadd.f32 %v1202_v30, %v1133_v46  ;;  %v1235_v1 = vadd.f32 %v1203_v21, %v1134_v60  ;;  %v680_v19 = vmul.f32 %v3687_v38, %v3792_v58  ;;  %v681_v47 = vmul.f32 %v3687_v38, %v3799_v32 }
 0x131   : > { %v2568_v18 = vpop.eup %2567  ;;  %v1704_v24 = vadd.f32 1.0, %v2566_v8  ;;  %2569 = verf.f32 %v1624_v42  ;;  %v781_v57 = vmul.f32 %v3696_v39, %v3801_v3  ;;  %v782_v53 = vmul.f32 %v3696_v39, %v3809_v13  ;;  %v4018_v8 = vld [vmem:[#allocation2 + $0x10f] sm:$0xff] }
 0x132   : > { %v1705_v59 = vadd.f32 1.0, %v2568_v18  ;;  %2571 = verf.f32 %v1625_v27  ;;  %v1337_v44 = vadd.f32 %v1305_v4, %v1234_v63  ;;  %v1338_v54 = vadd.f32 %v1306_v51, %v1235_v1  ;;  %v4024_v63 = vld [vmem:[#allocation2 + $0x110] sm:$0xff] }
 0x133   : > { %v1736_v41 = vmul.f32 %v1704_v24, %v1608_v56  ;;  %v813_v5 = vadd.f32 %v781_v57, %v680_v19  ;;  %v882_v58 = vmul.f32 %v3707_v45, %v3814_v33  ;;  %v883_v32 = vmul.f32 %v3707_v45, %v3840_v40  ;;  %v4256_v24 = vld [vmem:[#allocation6_spill] sm:$0xff] }
 0x134   : > { %v1737_v30 = vmul.f32 %v1705_v59, %v1609_v10  ;;  %v1438_v21 = vadd.f32 %v1406_v28, %v1337_v44  ;;  %v1439_v46 = vadd.f32 %v1407_v2, %v1338_v54  ;;  %v814_v60 = vadd.f32 %v782_v53, %v681_v47  ;;  %v4022_v2 = vld [vmem:[#allocation2 + $0x108] sm:$0xff] }
 0x135   : > { %v914_v3 = vadd.f32 %v882_v58, %v813_v5  ;;  %v984_v4 = vmul.f32 %v3716_v6, %v3914_v9  ;;  %v985_v56 = vmul.f32 %v3716_v6, %v3916_v16  ;;  %v1592_v13 = vmul.f32 0.5, %v1560_v35 }
 0x136   : > { %v2454_v51 = vpack.c.bf16 %v1737_v30, %v1736_v41  ;;  %v1539_v42 = vadd.f32 %v1507_v7, %v1438_v21  ;;  %v1540_v27 = vadd.f32 %v1508_v37, %v1439_v46  ;;  %v1593_v33 = vmul.f32 0.5, %v1561_v26  ;;  %v4034_v37 = vld [vmem:[#allocation2 + $0x109] sm:$0xff] }
 0x137   : > { %v915_v10 = vadd.f32 %v883_v32, %v814_v60  ;;  %v1016_v28 = vadd.f32 %v984_v4, %v914_v3  ;;  %v1085_v40 = vmul.f32 %v3729_v43, %v3924_v11  ;;  %v1086_v7 = vmul.f32 %v3729_v43, %v3928_v48 }
 0x138   : > { %2456 = vmatprep.subr.msk.bf16.mxu0 %vm3424_vm3, %v2454_v51  ;;  %v1578_v1 = vadd.f32 %v3879_v61, %v1539_v42  ;;  %v1579_v35 = vadd.f32 %v3879_v61, %v1540_v27  ;;  %v1186_v26 = vmul.f32 %v3745_v49, %v3930_v34  ;;  %v1187_v47 = vmul.f32 %v3745_v49, %v4256_v24  ;;  %v4257_v51 = vld [vmem:[#allocation10_spill] sm:$0xff] }
 0x139   : > { %v1017_v19 = vadd.f32 %v985_v56, %v915_v10  ;;  %v1117_v18 = vadd.f32 %v1085_v40, %v1016_v28  ;;  %v1290_v57 = vmul.f32 %v3758_v52, %v4018_v8  ;;  %v1390_v54 = vmul.f32 %v3823_v31, %v4022_v2  ;;  %v4053_v10 = vld [vmem:[#allocation2 + $0x111] sm:$0xff] }
 0x13a   : > { %v1642_v59 = vmul.f32 0.70710677, %v1578_v1  ;;  %v1643_v44 = vmul.f32 0.70710677, %v1579_v35  ;;  %v1391_v41 = vmul.f32 %v3823_v31, %v4024_v63  ;;  %v4044_v5 = vmul.f32 0.5, %v1578_v1 }
 0x13b   : > { %v2570_v53 = vpop.eup %2569  ;;  %v1118_v58 = vadd.f32 %v1086_v7, %v1017_v19  ;;  %v1218_v30 = vadd.f32 %v1186_v26, %v1117_v18  ;;  %v1491_v21 = vmul.f32 %v3832_v55, %v4034_v37  ;;  %v698_v60 = vmul.f32 %v3687_v38, %v3856_v23 }
 0x13c   : > { %v2572_v46 = vpop.eup %2571  ;;  %v1688_v32 = vadd.f32 1.0, %v2570_v53  ;;  %2573 = verf.f32 %v1642_v59  ;;  %v699_v3 = vmul.f32 %v3687_v38, %v3858_v0  ;;  %v799_v28 = vmul.f32 %v3696_v39, %v3860_v62  ;;  %v1272_v53 = vld [vmem:[#allocation2 + $0x22f] sm:$0xff] }
 0x13d   : > { %v1689_v4 = vadd.f32 1.0, %v2572_v46  ;;  %2575 = verf.f32 %v1643_v44  ;;  %v1219_v56 = vadd.f32 %v1187_v47, %v1118_v58  ;;  %v1321_v42 = vadd.f32 %v4257_v51, %v1218_v30  ;;  %v1473_v46 = vld [vmem:[#allocation2 + $0x229] sm:$0xff] }
 0x13e   : > { %v1720_v27 = vmul.f32 %v1688_v32, %v1592_v13  ;;  %v800_v40 = vmul.f32 %v3696_v39, %v3862_v36  ;;  %v900_v23 = vmul.f32 %v3707_v45, %v3874_v20  ;;  %v901_v26 = vmul.f32 %v3707_v45, %v3882_v15 }
 0x13f   : > { %v1721_v1 = vmul.f32 %v1689_v4, %v1593_v33  ;;  %v1322_v7 = vadd.f32 %v1290_v57, %v1219_v56  ;;  %v1422_v0 = vadd.f32 %v1390_v54, %v1321_v42  ;;  %v831_v19 = vadd.f32 %v799_v28, %v698_v60  ;;  %v1271_v33 = vld [vmem:[#allocation2 + $0x227] sm:$0xff] }
 0x140   : > { %v832_v18 = vadd.f32 %v800_v40, %v699_v3  ;;  %v1002_v13 = vmul.f32 %v3716_v6, %v3966_v12  ;;  %v1003_v62 = vmul.f32 %v3716_v6, %v3970_v17  ;;  %v1492_v36 = vmul.f32 %v3832_v55, %v4053_v10  ;;  %v1372_v12 = vld [vmem:[#allocation2 + $0x228] sm:$0xff]  ;;  %v1474_v3 = vld [vmem:[#allocation2 + $0x231] sm:$0xff] }
 0x141   : > { %v2457_v47 = vpack.c.bf16 %v1721_v1, %v1720_v27  ;;  %v1423_v59 = vadd.f32 %v1391_v41, %v1322_v7  ;;  %v1523_v20 = vadd.f32 %v1491_v21, %v1422_v0  ;;  %v932_v57 = vadd.f32 %v900_v23, %v831_v19  ;;  %v1373_v21 = vld [vmem:[#allocation2 + $0x230] sm:$0xff] }
 0x142   : > { %v933_v44 = vadd.f32 %v901_v26, %v832_v18  ;;  %v1103_v15 = vmul.f32 %v3729_v43, %v3972_v50  ;;  %v1104_v54 = vmul.f32 %v3729_v43, %v3980_v29  ;;  %v1611_v17 = vmul.f32 0.5, %v1579_v35 }
 0x143   : > { %2459 = vmatpush3.bf16.xpose.msk.msra.mxu0 %vm3424_vm3, %v2457_v47  ;;  %v1524_v41 = vadd.f32 %v1492_v36, %v1423_v59  ;;  %v1562_v58 = vadd.f32 %v3879_v61, %v1523_v20  ;;  %v1204_v30 = vmul.f32 %v3745_v49, %v3982_v14  ;;  %v1034_v32 = vadd.f32 %v1002_v13, %v932_v57 }
 0x144   : > { %v1035_v60 = vadd.f32 %v1003_v62, %v933_v44  ;;  %v1205_v50 = vmul.f32 %v3745_v49, %v3990_v22  ;;  %v1307_v29 = vmul.f32 %v3758_v52, %v1271_v33  ;;  %v1308_v35 = vmul.f32 %v3758_v52, %v1272_v53  ;;  %v2627_v53 = vld [vmem:[#allocation2 + $0x107] sm:$0xff] }
 0x145   : > { %v1563_v4 = vadd.f32 %v3879_v61, %v1524_v41  ;;  %v1626_v56 = vmul.f32 0.70710677, %v1562_v58  ;;  %v1408_v51 = vmul.f32 %v3823_v31, %v1372_v12  ;;  %v1135_v27 = vadd.f32 %v1103_v15, %v1034_v32 }
 0x146   : > { %v2574_v42 = vpop.eup %2573  ;;  %v1136_v14 = vadd.f32 %v1104_v54, %v1035_v60  ;;  %v1409_v28 = vmul.f32 %v3823_v31, %v1373_v21  ;;  %v1509_v40 = vmul.f32 %v3832_v55, %v1473_v46  ;;  %v1510_v7 = vmul.f32 %v3832_v55, %v1474_v3 }
 0x147   : > { %v2576_v23 = vpop.eup %2575  ;;  %v1706_v1 = vadd.f32 1.0, %v2574_v42  ;;  %v1627_v22 = vmul.f32 0.70710677, %v1563_v4  ;;  %2577 = verf.f32 %v1626_v56  ;;  %v1236_v26 = vadd.f32 %v1204_v30, %v1135_v27 }
 0x148   : > { %v1707_v0 = vadd.f32 1.0, %v2576_v23  ;;  %v1237_v19 = vadd.f32 %v1205_v50, %v1136_v14  ;;  %v682_v18 = vmul.f32 %v3687_v38, %v3914_v9  ;;  %v683_v62 = vmul.f32 %v3687_v38, %v3916_v16 }
 0x149   : > { %v1738_v13 = vmul.f32 %v1706_v1, %v4044_v5  ;;  %2579 = verf.f32 %v1627_v22  ;;  %v783_v47 = vmul.f32 %v3696_v39, %v3924_v11  ;;  %v1339_v36 = vadd.f32 %v1307_v29, %v1236_v26  ;;  %v1748_v26 = vld [vmem:[%s4229_s4 + $0x10] sm:$0xff] }
 0x14a   : > { %v1739_v59 = vmul.f32 %v1707_v0, %v1611_v17  ;;  %v1340_v20 = vadd.f32 %v1308_v35, %v1237_v19  ;;  %v784_v33 = vmul.f32 %v3696_v39, %v3928_v48  ;;  %v884_v44 = vmul.f32 %v3707_v45, %v3930_v34  ;;  %v1356_v35 = vld [vmem:[#allocation2 + $0x128] sm:$0xff]  ;;  %v1458_v0 = vld [vmem:[#allocation2 + $0x131] sm:$0xff] }
 0x14b   : > { %v815_v57 = vadd.f32 %v783_v47, %v682_v18  ;;  %v885_v9 = vmul.f32 %v3707_v45, %v4256_v24  ;;  %v1440_v15 = vadd.f32 %v1408_v51, %v1339_v36  ;;  %v986_v11 = vmul.f32 %v2627_v53, %v3716_v6  ;;  %v1255_v24 = vld [vmem:[#allocation2 + $0x127] sm:$0xff] }
 0x14c   : > { %v2460_v5 = vpack.c.bf16 %v1739_v59, %v1738_v13  ;;  %v1441_v54 = vadd.f32 %v1409_v28, %v1340_v20  ;;  %v816_v38 = vadd.f32 %v784_v33, %v683_v62  ;;  %v987_v34 = vmul.f32 %v3716_v6, %v4018_v8  ;;  %v1256_v8 = vld [vmem:[#allocation2 + $0x12f] sm:$0xff]  ;;  %v2008_v33 = vld [vmem:[%s4231_s6] sm:$0xf] }
 0x14d   : > { %v916_v16 = vadd.f32 %v884_v44, %v815_v57  ;;  %v1541_v12 = vadd.f32 %v1509_v40, %v1440_v15  ;;  %v1087_v45 = vmul.f32 %v3729_v43, %v4022_v2  ;;  %v1594_v41 = vmul.f32 0.5, %v1562_v58  ;;  %v1457_v28 = vld [vmem:[#allocation2 + $0x129] sm:$0xff] }
 0x14e   : > { %2462 = vmatprep.subr.msk.bf16.mxu0 %vm3424_vm3, %v2460_v5  ;;  %v1542_v39 = vadd.f32 %v1510_v7, %v1441_v54  ;;  %v917_v48 = vadd.f32 %v885_v9, %v816_v38  ;;  %v1595_v60 = vmul.f32 0.5, %v1563_v4  ;;  %v1088_v50 = vmul.f32 %v3729_v43, %v4024_v63  ;;  %v1746_v4 = vld [vmem:[%s4229_s4] sm:$0xff]  ;;  %v1747_v43 = vld [vmem:[%s4229_s4 + $0x8] sm:$0xff] }
 0x14f   : > { %v1018_v17 = vadd.f32 %v986_v11, %v916_v16  ;;  %v1580_v30 = vadd.f32 %v3879_v61, %v1541_v12  ;;  %v1188_v6 = vmul.f32 %v3745_v49, %v4034_v37  ;;  %v1189_v2 = vmul.f32 %v3745_v49, %v4053_v10  ;;  %v1357_v10 = vld [vmem:[#allocation2 + $0x130] sm:$0xff] }
 0x150   : > { %v1581_v21 = vadd.f32 %v3879_v61, %v1542_v39  ;;  %v1019_v46 = vadd.f32 %v987_v34, %v917_v48  ;;  %v1291_v58 = vmul.f32 %v3758_v52, %v1255_v24  ;;  %v1292_v49 = vmul.f32 %v3758_v52, %v1256_v8  ;;  %v1749_v52 = vld [vmem:[%s4229_s4 + $0x18] sm:$0xff] }
 0x151   : > { %v2578_v32 = vpop.eup %2577  ;;  %v1119_v29 = vadd.f32 %v1087_v45, %v1018_v17  ;;  %v1644_v56 = vmul.f32 0.70710677, %v1580_v30  ;;  %v2695_v40 = vmov 0   ;;  %v1392_v22 = vmul.f32 %v3823_v31, %v1356_v35 }
 0x152   : > { %v1690_v3 = vadd.f32 1.0, %v2578_v32  ;;  %v1645_v51 = vmul.f32 0.70710677, %v1581_v21  ;;  %v1120_v37 = vadd.f32 %v1088_v50, %v1019_v46  ;;  %2523 = vset.pattern.permute.xlu0 %v2695_v40  ;;  %2524 = vset.pattern.permute.xlu1 %v2695_v40  ;;  %v1393_v18 = vmul.f32 %v3823_v31, %v1357_v10  ;;  %v2100_v31 = vld [vmem:[%s4233_s8] sm:$0xf]  ;;  %v1744_v50 = vld [vmem:[%s4228_s3 + $0x10] sm:$0xff] }
 0x153   : > { %v2580_v63 = vpop.eup %2579  ;;  %v1220_v42 = vadd.f32 %v1188_v6, %v1119_v29  ;;  %2581 = verf.f32 %v1644_v56  ;;  %1752 = vperm.xlu0 %2523, %v1746_v4   ;;  %1757 = vperm.xlu1 %2524, %v1747_v43   ;;  %v1493_v62 = vmul.f32 %v3832_v55, %v1457_v28  ;;  %v1494_v36 = vmul.f32 %v3832_v55, %v1458_v0 }
 0x154   : > { %v1691_v27 = vadd.f32 1.0, %v2580_v63  ;;  %v1722_v14 = vmul.f32 %v1690_v3, %v1594_v41  ;;  %2583 = verf.f32 %v1645_v51  ;;  %v1221_v23 = vadd.f32 %v1189_v2, %v1120_v37 }
 0x155   : > { %v1323_v1 = vadd.f32 %v1291_v58, %v1220_v42  ;;  %v1612_v54 = vmul.f32 0.5, %v1580_v30  ;;  %v1613_v53 = vmul.f32 0.5, %v1581_v21  ;;  %v1743_v21 = vld [vmem:[%s4228_s3 + $0x8] sm:$0xff] }
 0x156   : > { %v1723_v7 = vmul.f32 %v1691_v27, %v1595_v60  ;;  %v1324_v19 = vadd.f32 %v1292_v49, %v1221_v23  ;;  %v2628_v60 = vld [vmem:[%s4228_s3] sm:$0xff] }
 0x157   : > { %v1424_v13 = vadd.f32 %v1392_v22, %v1323_v1  ;;  %1762 = vperm.xlu1 %2524, %v1748_v26   ;;  %1767 = vperm.xlu0 %2523, %v1749_v52  }
 0x158   : > { %v2463_v47 = vpack.c.bf16 %v1723_v7, %v1722_v14  ;;  %v1425_v59 = vadd.f32 %v1393_v18, %v1324_v19 }
 0x159   : > { %v1525_v20 = vadd.f32 %v1493_v62, %v1424_v13 }
 0x15a   : > { %2465 = vmatpush3.bf16.xpose.msk.msra.mxu0 %vm3424_vm3, %v2463_v47  ;;  %v1526_v57 = vadd.f32 %v1494_v36, %v1425_v59 }
 0x15b   : > { %v1564_v44 = vadd.f32 %v3879_v61, %v1525_v20  ;;  %2011 = vperm.xlu1 %2524, %v2008_v33   ;;  %2103 = vperm.xlu0 %2523, %v2100_v31  }
 0x15c   : > { %v1565_v9 = vadd.f32 %v3879_v61, %v1526_v57 }
 0x15d   : > { %v1628_v55 = vmul.f32 0.70710677, %v1564_v44  ;;  %v2582_v5 = vpop.eup %2581  ;;  %v1596_v61 = vmul.f32 0.5, %v1564_v44 }
 0x15e   : > { %v2584_v15 = vpop.eup %2583  ;;  %v1708_v38 = vadd.f32 1.0, %v2582_v5  ;;  %v1629_v16 = vmul.f32 0.70710677, %v1565_v9  ;;  %v1597_v24 = vmul.f32 0.5, %v1565_v9 }
 0x15f   : > { %2585 = verf.f32 %v1628_v55  ;;  %v1709_v11 = vadd.f32 1.0, %v2584_v15 }
 0x160   : > { %v1740_v12 = vmul.f32 %v1708_v38, %v1612_v54  ;;  %2587 = verf.f32 %v1629_v16 }
 0x161   : > { %v1741_v39 = vmul.f32 %v1709_v11, %v1613_v53 }
 0x163   : > { %v2466_v48 = vpack.c.bf16 %v1741_v39, %v1740_v12 }
 0x165   : > { %2468 = vmatprep.subr.msk.bf16.mxu0 %vm3424_vm3, %v2466_v48 }
 0x169   : > { %v2586_v34 = vpop.eup %2585 }
 0x16a   : > { %v1692_v17 = vadd.f32 1.0, %v2586_v34  ;;  %v2588_v45 = vpop.eup %2587 }
 0x16b   : > { %v1693_v41 = vadd.f32 1.0, %v2588_v45 }
 0x16c   : > { %v1724_v46 = vmul.f32 %v1692_v17, %v1596_v61 }
 0x16d   : > { %v1725_v30 = vmul.f32 %v1693_v41, %v1597_v24 }
 0x16f   : > { %v2469_v32 = vpack.c.bf16 %v1725_v30, %v1724_v46 }
 0x171   : > { %2471 = vmatpush3.bf16.xpose.msk.msra.mxu0 %vm3424_vm3, %v2469_v32 }
 0x178   : > { %2417 = vmatmul.mubr.msk.f32.vlgmr.msra.gmra.mrb[0].mxu0 %vm331_vm0, %v2628_v60 }
 0x179   : > { %2418 = vmatprep.mubr.msk.f32.mxu0 %vm331_vm0, %v1743_v21 }
 0x17c   : > { %2419 = vmatmul.mubr.msk.f32.gmra.mrb[2].mxu0 %vm331_vm0, %v1743_v21 }
 0x17d   : > { %2420 = vmatprep.mubr.msk.f32.mxu0 %vm331_vm0, %v1744_v50 }
 0x180   : > { %2421 = vmatmul.mubr.msk.f32.gmra.mrb[4].mxu0 %vm331_vm0, %v1744_v50 }
 0x181   : > { %2422 = vmatprep.mubr.msk.f32.mxu0 %vm331_vm0, %v1745_v25 }
 0x184   : > { %2423 = vmatmul.mubr.msk.f32.gmra.mrb[6].mxu0 %vm331_vm0, %v1745_v25 }
 0x1d2   : > { %v1753_v29 = vpop.permute.xlu0 %1752  ;;  %v1758_v56 = vpop.permute.xlu1 %1757 }
 0x1d6   : > { %v1763_v42 = vpop.permute.xlu1 %1762  ;;  %v1768_v23 = vpop.permute.xlu0 %1767 }
 0x24b   : > { %v1944_v6 = vpop.f32.mrb[0].mxu0 }
 0x24c   : > { %v1945_v8 = vadd.f32 %v1944_v6, %v1753_v29  ;;  %v1946_v3 = vpop.f32.mrb[1].mxu0  ;;  %v4258_v6 = vmov 0.0  }
 0x24d   : > { %v1947_v2 = vadd.f32 %v1946_v3, %v1753_v29  ;;  %v2007_v29 = vld [vmem:[%s4230_s5] sm:$0xf] }
 0x24e   : > { %v1975_v58 = vmul.f32 0.70710677, %v1945_v8  ;;  %v1967_v20 = vmul.f32 0.5, %v1945_v8  ;;  %v2012_v8 = vpop.permute.xlu1 %2011 }
 0x24f   : > { %v1976_v35 = vmul.f32 0.70710677, %v1947_v2  ;;  %v1950_v4 = vpop.f32.mrb[2].mxu0  ;;  %v1968_v57 = vmul.f32 0.5, %v1947_v2 }
 0x250   : > { %2589 = verf.f32 %v1975_v58  ;;  %v1951_v43 = vadd.f32 %v1950_v4, %v1758_v56  ;;  %v1952_v63 = vpop.f32.mrb[3].mxu0 }
 0x251   : > { %2591 = verf.f32 %v1976_v35  ;;  %v1953_v51 = vadd.f32 %v1952_v63, %v1758_v56 }
 0x252   : > { %v1977_v37 = vmul.f32 0.70710677, %v1951_v43  ;;  %v1969_v33 = vmul.f32 0.5, %v1951_v43 }
 0x253   : > { %v1978_v27 = vmul.f32 0.70710677, %v1953_v51  ;;  %v1956_v14 = vpop.f32.mrb[4].mxu0  ;;  %v1970_v44 = vmul.f32 0.5, %v1953_v51 }
 0x254   : > { %2593 = verf.f32 %v1977_v37  ;;  %v1957_v49 = vadd.f32 %v1956_v14, %v1763_v42  ;;  %v1958_v10 = vpop.f32.mrb[5].mxu0 }
 0x255   : > { %2595 = verf.f32 %v1978_v27  ;;  %v1959_v28 = vadd.f32 %v1958_v10, %v1763_v42  ;;  %v2099_v10 = vld [vmem:[%s4232_s7] sm:$0xf] }
 0x256   : > { %v1979_v40 = vmul.f32 0.70710677, %v1957_v49  ;;  %v1971_v61 = vmul.f32 0.5, %v1957_v49 }
 0x257   : > { %v1980_v1 = vmul.f32 0.70710677, %v1959_v28  ;;  %v1962_v22 = vpop.f32.mrb[6].mxu0  ;;  %v1972_v24 = vmul.f32 0.5, %v1959_v28  ;;  %v2104_v28 = vpop.permute.xlu0 %2103 }
 0x258   : > { %2597 = verf.f32 %v1979_v40  ;;  %v1963_v7 = vadd.f32 %v1962_v22, %v1768_v23  ;;  %v1964_v0 = vpop.f32.mrb[7].mxu0 }
 0x259   : > { %2599 = verf.f32 %v1980_v1  ;;  %v1965_v26 = vadd.f32 %v1964_v0, %v1768_v23 }
 0x25a   : > { %v2590_v52 = vpop.eup %2589  ;;  %v1981_v19 = vmul.f32 0.70710677, %v1963_v7  ;;  %v1973_v17 = vmul.f32 0.5, %v1963_v7 }
 0x25b   : > { %v2592_v18 = vpop.eup %2591  ;;  %v1982_v13 = vmul.f32 0.70710677, %v1965_v26  ;;  %v1991_v62 = vadd.f32 1.0, %v2590_v52  ;;  %v1974_v41 = vmul.f32 0.5, %v1965_v26 }
 0x25c   : > { %2601 = verf.f32 %v1981_v19  ;;  %v1992_v59 = vadd.f32 1.0, %v2592_v18 }
 0x25d   : > { %2603 = verf.f32 %v1982_v13  ;;  %v1999_v55 = vmul.f32 %v1991_v62, %v1967_v20 }
 0x25e   : > { %v2594_v47 = vpop.eup %2593  ;;  %v2000_v54 = vmul.f32 %v1992_v59, %v1968_v57 }
 0x25f   : > { %v2596_v36 = vpop.eup %2595  ;;  %v1993_v31 = vadd.f32 1.0, %v2594_v47 }
 0x260   : > { %v1994_v9 = vadd.f32 1.0, %v2596_v36 }
 0x261   : > { %v2001_v5 = vmul.f32 %v1993_v31, %v1969_v33 }
 0x262   : > { %v2598_v15 = vpop.eup %2597  ;;  %v2002_v38 = vmul.f32 %v1994_v9, %v1970_v44  ;;  %v2696_v9 = vmov 1966171168  }
 0x263   : > { %v2600_v16 = vpop.eup %2599  ;;  %v2474_v53 = vpack.c.bf16 %v2001_v5, %v1999_v55  ;;  %v1995_v12 = vadd.f32 1.0, %v2598_v15  ;;  %v2219_v55 = vunpack.c.l.s4 %v2696_v9  ;;  %v2221_v5 = vlaneseq }
 0x264   : > { %v2472_v11 = vpack.c.bf16 %v2002_v38, %v2000_v54  ;;  %v1996_v48 = vadd.f32 1.0, %v2600_v16 }
 0x265   : > { %v2003_v30 = vmul.f32 %v1995_v12, %v1971_v61  ;;  %vm2235_vm6 = vcmp.lt.s32.totalorder %v2221_v5, 256 }
 0x266   : > { %v2602_v39 = vpop.eup %2601  ;;  %2473 = vmatprep.subr.bf16.mxu1 %v2472_v11  ;;  %v2004_v21 = vmul.f32 %v1996_v48, %v1972_v24  ;;  %v2222_v11 = vshrl.u32 %v2221_v5, 7 }
 0x267   : > { %v2604_v34 = vpop.eup %2603  ;;  %v1997_v45 = vadd.f32 1.0, %v2602_v39  ;;  %2475 = vmatpush1.bf16.msra.mxu1 %v2474_v53  ;;  %v2220_v53 = vunpack.c.0.s8 %v2219_v55 }
 0x268   : > { %v1998_v46 = vadd.f32 1.0, %v2604_v34 }
 0x269   : > { %v2005_v32 = vmul.f32 %v1997_v45, %v1973_v17  ;;  %v2223_v61 = vsub.s32 %v2220_v53, %v2222_v11 }
 0x26a   : > { %v2006_v60 = vmul.f32 %v1998_v46, %v1974_v41 }
 0x26b   : > { %v2478_v50 = vpack.c.bf16 %v2005_v32, %v2003_v30 }
 0x26c   : > { %v2476_v25 = vpack.c.bf16 %v2006_v60, %v2004_v21 }
 0x26e   : > { %2477 = vmatprep.subr.bf16.mxu1 %v2476_v25 }
 0x26f   : > { %2479 = vmatpush1.bf16.msra.mxu1 %v2478_v50 }
 0x272   : > { %2371 = vmatmul.mubr.msk.f32.vlgmr.msra.gmra.mrb[0].mxu1 %vm2014_vm4, %v2007_v29 }
 0x273   : > { %2180 = vmatprep.mubr.f32.mxu1 %v4258_v6 }
 0x345   : > { %v2084_v3 = vpop.f32.mrb[0].mxu1 }
 0x346   : > { %v2085_v56 = vadd.f32 %v2084_v3, %v2012_v8  ;;  %v2086_v2 = vpop.f32.mrb[1].mxu1 }
 0x347   : > { %v2087_v58 = vadd.f32 %v2086_v2, %v2012_v8 }
 0x348   : > { %v2091_v35 = vmul.f32 0.70710677, %v2085_v56  ;;  %v2089_v27 = vmul.f32 0.5, %v2085_v56 }
 0x349   : > { %v2092_v4 = vmul.f32 0.70710677, %v2087_v58  ;;  %v2090_v37 = vmul.f32 0.5, %v2087_v58 }
 0x34a   : > { %2605 = verf.f32 %v2091_v35 }
 0x34b   : > { %2607 = verf.f32 %v2092_v4 }
 0x354   : > { %v2606_v43 = vpop.eup %2605 }
 0x355   : > { %v2608_v63 = vpop.eup %2607  ;;  %v2095_v51 = vadd.f32 1.0, %v2606_v43 }
 0x356   : > { %v2096_v42 = vadd.f32 1.0, %v2608_v63 }
 0x357   : > { %v2097_v49 = vmul.f32 %v2095_v51, %v2089_v27 }
 0x358   : > { %v2098_v14 = vmul.f32 %v2096_v42, %v2090_v37 }
 0x35a   : > { %2372 = vmatprep.subr.msk.mxu1 %vm2109_vm5, %v2098_v14 }
 0x35b   : > { %2373 = vmatpush1.msk.msra.mxu1 %vm2109_vm5, %v2097_v49 }
 0x35c   : > { %2374 = vmatmul.mubr.msk.f32.vlgmr.msra.gmra.mrb[2].mxu1 %vm565_vm2, %v2099_v10 }
 0x42f   : > { %v2182_v40 = vpop.f32.mrb[2].mxu1 }
 0x430   : > { %v2183_v23 = vadd.f32 %v2182_v40, %v2104_v28  ;;  %v2184_v1 = vpop.f32.mrb[3].mxu1 }
 0x431   : > { %v2185_v22 = vadd.f32 %v2184_v1, %v2104_v28 }
 0x432   : > { %v2375_v7 = vmul.f32 -1.442695, %v2183_v23 }
 0x433   : > { %v2376_v0 = vmul.f32 -1.442695, %v2185_v22 }
 0x434   : > { %2609 = vpow2.f32 %v2375_v7 }
 0x435   : > { %2611 = vpow2.f32 %v2376_v0 }
 0x43e   : > { %v2610_v26 = vpop.eup %2609 }
 0x43f   : > { %v2612_v52 = vpop.eup %2611  ;;  %v2193_v19 = vadd.f32 1.0, %v2610_v26 }
 0x440   : > { %v2194_v18 = vadd.f32 1.0, %v2612_v52 }
 0x441   : > { %2613 = vrcp.f32 %v2193_v19 }
 0x442   : > { %2615 = vrcp.f32 %v2194_v18 }
 0x44b   : > { %v2614_v13 = vpop.eup %2613 }
 0x44c   : > { %v2616_v62 = vpop.eup %2615  ;;  %v2199_v47 = vmul.f32 %v2614_v13, %v2097_v49 }
 0x44d   : > { %v2200_v59 = vmul.f32 %v2616_v62, %v2098_v14 }
 0x44e   : > { %v2201_v36 = vsel %vm2109_vm5, %v2199_v47, 0.0 }
 0x44f   : > { %v2202_v20 = vrot.slane %v2201_v36, 4  ;;  %v2208_v33 = vsel %vm2109_vm5, %v2200_v59, 0.0 }
 0x450   : > { %v2209_v31 = vrot.slane %v2208_v33, 4 }
 0x451   : > { %v2203_v57 = vadd.f32 %v2202_v20, %v2201_v36 }
 0x452   : > { %v2210_v44 = vadd.f32 %v2209_v31, %v2208_v33 }
 0x453   : > { %v2204_v15 = vrot.slane %v2203_v57, 2 }
 0x454   : > { %v2211_v54 = vrot.slane %v2210_v44, 2 }
 0x455   : > { %v2205_v38 = vadd.f32 %v2204_v15, %v2203_v57 }
 0x456   : > { %v2212_v16 = vadd.f32 %v2211_v54, %v2210_v44 }
 0x457   : > { %v2206_v12 = vrot.slane %v2205_v38, 1 }
 0x458   : > { %v2213_v39 = vrot.slane %v2212_v16, 1 }
 0x459   : > { %v2207_v48 = vadd.f32 %v2206_v12, %v2205_v38 }
 0x45a   : > { %v2214_v34 = vadd.f32 %v2213_v39, %v2212_v16 }
 0x45c   : > { %v2217_v17 = vcombine.low %v2207_v48, %v2214_v34 }
 0x45e   : > { %v2224_v45 = vrot.slane %v2217_v17, %v2223_v61 }
 0x460   : > { %v2231_v24 = vrot.slane %v2224_v45, %v2223_v61 }
 0x462   : > { %2237 = vst.msk [vmem:[%s325_s24] sm:$0x3] %vm2235_vm6, %v2231_v24 }
 0x463   : > { %2642 = shalt.err (!%p2639_p3)
}
 0x464   : > { %s2643_s21 = scalar_lea.hbm %s4183_s28, 32  ;;  %s2647_s24 = scalar_lea.hbm %s4234_s9, 64 }
 0x465   : > { %p2644_p4 = scmp.ne.s32.totalorder %s4183_s28, %s2643_s21  ;;  %p2648_p9 = scmp.lt.u32.totalorder %s4183_s28, %s4234_s9 }
 0x466   : > { %p2649_p10 = scmp.lt.u32.totalorder %s2647_s24, %s2643_s21  ;;  %p2651_p12 = scmp.lt.u32.totalorder %s2643_s21, %s4183_s28 }
 0x467   : > { %p2645_p7 = pnand %p2644_p4, %p2786_p5 }
 0x468   : > { %p2650_p11 = por %p2649_p10, %p2648_p9 }
 0x469   : > { %p2646_p8 = pneg %p2645_p7 }
 0x46a   : > { %p2652_p13 = por %p2651_p12, %p2650_p11 }
 0x46c   : > { %p2653_p0 = pnand %p2652_p13, %p2646_p8 }
 0x46e   : > { %2656 = shalt.err (!%p2653_p0)
}
 0x46f   : > { %2480 = dma.vmem_to_hbm [thread:$0]  (%p2786_p5), %s4185_s25, 32, %s4183_s28, %s2239_s29  }
 0x470 PF: > { %p2486_p1 = scmp.ge.s32.totalorder %s2691_s12, 2  ;;  %s2265_s14 = sand.u32 1, %s2679_s30  }
 0x471   : > { %s2266_s13 = scalar_lea.sflag [#allocation4], %s2265_s14 }
 0x472   : > { %p2483_p2 = pnand %p2486_p1, %p2790_p6 }
 0x474   : > { %2674 = dma.done.wait (!%p2483_p2), %s2266_s13, 32  }
 0x475   : > { %2676 = vsyncadd (!%p2483_p2), %s2266_s13, 4294967264  ;;  %p19_p3 = scmp.ge.s32.totalorder %s2773_s15, 4   ;;  %s4259_s30 = smov %s2683_s10 }
 0x476   : > { %s4260_s10 = smov %s2687_s11  ;;  %s4261_s11 = smov %s2784_s18 }
 0x477   : > { %s4262_s12 = smov %s2773_s15  ;;  %21 = sbr.rel (!%p19_p3) target bundleno = 3 (0x3), region = 95 }
 0x47e   :  { %2271 = vsyncpa [#allocation4], 1 }
 0x47f   :  { %2273 = vsyncpa [#allocation4 + $0x1], 1 }

</bundles_post_ra>
